<compile_context>
chip_gen: v7x
topology: tpu7x:2x2x1
jax: 0.10.0
libtpu: 0.0.40
codegen_flags: <defaults>
</compile_context>

<pallas_src>
import functools
import math

import jax
import jax.numpy as jnp
from jax.experimental import pallas as pl
from jax.experimental.pallas import tpu as pltpu

# Model hyper-parameters (small, consistent with the module's __init__).
NUM_HEADS = 2
MODEL_DIM = 32
D_K = 8
D_V = 8
INV_INFINITY = 1e-12          # 1 / word.INFINITY_NUMBER
GRAPHS_PER_BLOCK = 16         # packing factor G (G*N=128, G*E=384 here)


def san_kernel(inp_t_ref, wqkv_t_ref, wo_t_ref, bo_t_ref, hsum_ref, hexp_ref,
               edge_meta_ref, tgt_col_ref, out_t_ref, attn_ref,
               *, num_heads, d_k, d_v, nodes_per_block, edges_per_block):
    f32 = jnp.float32
    hk = num_heads * d_k

    # Fused, bias-folded Q|K|V projection, feature-major:
    #   (3*H*dk, D+1) @ (D+1, G*N); the last input row is ones (bias fold).
    qkv_t = jnp.dot(wqkv_t_ref[...], inp_t_ref[...], preferred_element_type=f32)
    q_t = qkv_t[:hk, :]                     # (H*dk, G*N)
    kv_t = qkv_t[hk:, :]                    # (H*(dk+dv), G*N)

    # Coalesced edge metadata (single DMA): rows [src, tgt, dist] over G*E
    # packed edges; src/tgt already offset host-side by g*N, so the one-hots
    # below are block-diagonal and graphs in the block never interact.
    src_row = edge_meta_ref[0:1, :].astype(jnp.int32)    # (1, G*E)
    tgt_row = edge_meta_ref[1:2, :].astype(jnp.int32)    # (1, G*E)
    dist_row = edge_meta_ref[2:3, :]                     # (1, G*E) f32

    node_iota = jax.lax.broadcasted_iota(
        jnp.int32, (nodes_per_block, edges_per_block), 0)
    src_sel = (src_row == node_iota).astype(f32)         # (G*N, G*E) gather@src
    tgt_sel = (tgt_row == node_iota).astype(f32)         # (G*N, G*E) gather@tgt
    node_iota_l = jax.lax.broadcasted_iota(
        jnp.int32, (edges_per_block, nodes_per_block), 1)
    tgt_scatter = (tgt_col_ref[...] == node_iota_l).astype(f32)  # (G*E, G*N)

    # index_select via one-hot matmuls; K and V gathered in a single MXU op.
    node_q_t = jnp.dot(q_t, tgt_sel, preferred_element_type=f32)     # (H*dk, G*E)
    node_kv_t = jnp.dot(kv_t, src_sel, preferred_element_type=f32)   # (H*(dk+dv), G*E)
    node_k_t = node_kv_t[:hk, :]
    node_v_t = node_kv_t[hk:, :]

    # Head-major per-edge scores via the constant head-sum matmul
    # (1/sqrt(dk) folded into the host-built mask).
    scores = jnp.dot(hsum_ref[...], node_q_t * node_k_t,
                     preferred_element_type=f32)                     # (H, G*E)
    # torch subtracts a per-graph global max; the shift cancels exactly in the
    # folded normalization below, so the per-block max is equivalent.
    scores = scores - jnp.max(scores)

    # Folded normalization: attn = (exp/dist) / segment_sum_tgt(exp/dist);
    # the eps of the first torch normalization cancels exactly.
    eod = jnp.exp(scores) / dist_row                                  # (H, G*E)
    seg = jnp.dot(eod, tgt_scatter, preferred_element_type=f32)      # (H, G*N)
    attn = eod / jnp.dot(seg, tgt_sel, preferred_element_type=f32)   # (H, G*E)
    attn_ref[...] = attn        # head-major, lane-dense store; dropout p=0

    # Broadcast per-head attn across d_v lanes (constant head-expand matmul),
    # weight the gathered values, scatter-add into nodes, project (+bias).
    weighted = node_v_t * jnp.dot(hexp_ref[...], attn,
                                  preferred_element_type=f32)        # (H*dv, G*E)
    agg_t = jnp.dot(weighted, tgt_scatter, preferred_element_type=f32)  # (H*dv, G*N)
    out_t_ref[...] = (jnp.dot(wo_t_ref[...], agg_t, preferred_element_type=f32)
                      + bo_t_ref[...])                                # (D, G*N)


def san_forward(inp, params, src_idx, tgt_idx, dist_edge,
                graphs_per_block=GRAPHS_PER_BLOCK):
    """Batched forward: inp (B,N,D), src/tgt (B,E) int32, dist_edge (B,E) f32."""
    B, N, D = inp.shape
    E = src_idx.shape[1]
    H = NUM_HEADS
    G = graphs_per_block
    assert B % G == 0, "batch size must be divisible by the packing factor"
    NB = B // G
    GN, GE = G * N, G * E
    f32 = jnp.float32

    # ---- host-side parameter prep (layout plumbing, done once) ----
    # Fused Q|K|V weights, transposed, with the biases folded in as an extra
    # column matched by a ones row appended to the transposed input.
    wqkv = jnp.concatenate([params["wq"], params["wk"], params["wv"]], axis=1)  # (D, 3*H*dk)
    bqkv = jnp.concatenate([params["bq"], params["bk"], params["bv"]], axis=1)  # (1, 3*H*dk)
    wqkv_t = jnp.concatenate([wqkv.T, bqkv.T], axis=1).astype(f32)              # (3*H*dk, D+1)
    wo_t = params["wo"].T.astype(f32)                                           # (D, H*dv)
    bo_t = params["bo"].T.astype(f32)                                           # (D, 1)

    # Constant per-head reduce / expand masks, hoisted out of the kernel body.
    hsum = ((jnp.arange(H)[:, None] == jnp.arange(H * D_K)[None, :] // D_K)
            .astype(f32) / math.sqrt(D_K))                                      # (H, H*dk)
    hexp = (jnp.arange(H * D_V)[:, None] // D_V
            == jnp.arange(H)[None, :]).astype(f32)                              # (H*dv, H)

    # ---- pack G graphs per grid step ----
    # Feature-major input with a trailing ones row for the bias fold.
    inp_t = inp.astype(f32).reshape(NB, GN, D).transpose(0, 2, 1)               # (NB, D, G*N)
    inp_t = jnp.concatenate([inp_t, jnp.ones((NB, 1, GN), f32)], axis=1)        # (NB, D+1, G*N)

    # Edge indices offset by g*N so the in-kernel one-hots are block-diagonal.
    offs = (jnp.arange(B, dtype=jnp.int32) % G) * N
    src_p = (src_idx.astype(jnp.int32) + offs[:, None]).reshape(NB, GE)
    tgt_p = (tgt_idx.astype(jnp.int32) + offs[:, None]).reshape(NB, GE)
    dist_p = dist_edge.astype(f32).reshape(NB, GE)

    # Coalesced row-form edge metadata (one DMA) + column-form tgt for scatter.
    edge_meta = jnp.stack([src_p.astype(f32), tgt_p.astype(f32), dist_p],
                          axis=1)                                                # (NB, 3, G*E)
    tgt_col = tgt_p.reshape(NB, GE, 1)                                           # (NB, G*E, 1)

    kernel = functools.partial(san_kernel, num_heads=H, d_k=D_K, d_v=D_V,
                               nodes_per_block=GN, edges_per_block=GE)

    def graph_spec(shape):   # per-block tensors: leading block dim squeezed off
        return pl.BlockSpec((None,) + tuple(shape), lambda b: (b, 0, 0))

    def weight_spec(arr):    # shared weights: constant block index -> resident
        return pl.BlockSpec(arr.shape, lambda b: (0, 0))

    # TODO(synk): large graphs — the dense (G*E, G*N) fp32 one-hots are O(E*N)
    # (e.g. N=1024/E=4096 -> 16 MiB each, x3 live), which exceeds v7x's 64 MiB
    # VMEM (and the 32 MiB scoped default everywhere) long before v5e/v6e.
    # For that regime, restructure with an "arbitrary" edge-tile grid axis,
    # PrefetchScalarGridSpec-prefetched src/tgt indices, >=512-edge tiles, a
    # resident (N, H*dv) VMEM accumulator for the scatter-add, and an explicit
    # vmem_limit_bytes.
    out_t, attn = pl.pallas_call(
        kernel,
        grid=(NB,),
        out_shape=(jax.ShapeDtypeStruct((NB, D, GN), f32),
                   jax.ShapeDtypeStruct((NB, H, GE), f32)),
        in_specs=[
            graph_spec((D + 1, GN)),     # transposed packed input (+ ones row)
            weight_spec(wqkv_t),         # fused Wq|Wk|Wv (+bias col), transposed
            weight_spec(wo_t),
            weight_spec(bo_t),
            weight_spec(hsum),           # constant head-sum mask (1/sqrt(dk) folded)
            weight_spec(hexp),           # constant head-expand mask
            graph_spec((3, GE)),         # [src | tgt | dist] rows (one DMA)
            graph_spec((GE, 1)),         # tgt indices, column form (scatter)
        ],
        out_specs=(graph_spec((D, GN)), graph_spec((H, GE))),
        compiler_params=pltpu.CompilerParams(
            dimension_semantics=("parallel",)),
    )(inp_t, wqkv_t, wo_t, bo_t, hsum, hexp, edge_meta, tgt_col)

    # Unpack the lane-dense outputs (pure XLA layout work outside the kernel).
    out = out_t.reshape(NB, D, G, N).transpose(0, 2, 3, 1).reshape(B, N, D)
    attn = attn.reshape(NB, H, G, E).transpose(0, 2, 1, 3).reshape(B, H, E)
    # attn_per_head mirrors torch: list of (B, E) per head (contiguous slices).
    attn_per_head = [attn[:, h, :] for h in range(H)]
    return out, attn_per_head


def san_reference(inp, params, src_idx, tgt_idx, dist_edge):
    """Pure-JAX reference mirroring the PyTorch forward (unfolded, with eps)."""
    H, dk, dv = NUM_HEADS, D_K, D_V

    def one_graph(x, s, t, d):
        N = x.shape[0]
        q = (x @ params["wq"] + params["bq"]).reshape(N, H, dk)
        k = (x @ params["wk"] + params["bk"]).reshape(N, H, dk)
        v = (x @ params["wv"] + params["bv"]).reshape(N, H, dv)
        node_key = k[s]
        node_query = q[t]
        node_value = v[s]
        scores = (node_query * node_key).sum(-1) / math.sqrt(dk)
        scores = scores - scores.max()
        es = jnp.exp(scores)
        nsum = jax.ops.segment_sum(es, t, num_segments=N)
        attn = es / (nsum[t] + INV_INFINITY)
        attn = attn / d[:, None]
        nasum = jax.ops.segment_sum(attn, t, num_segments=N)
        attn = attn / nasum[t]
        weighted = node_value * attn[:, :, None]
        agg = jax.ops.segment_sum(weighted, t, num_segments=N).reshape(N, H * dv)
        return agg @ params["wo"] + params["bo"], attn

    return jax.vmap(one_graph)(inp, src_idx, tgt_idx, dist_edge)


def init_params(key):
    """Deterministic synthetic init (xavier-ish weights, zero biases)."""
    k1, k2, k3, k4 = jax.random.split(key, 4)

    def xavier(k, shape):
        fan_in, fan_out = shape
        a = math.sqrt(6.0 / (fan_in + fan_out))
        return jax.random.uniform(k, shape, jnp.float32, -a, a)

    return {
        "wq": xavier(k1, (MODEL_DIM, NUM_HEADS * D_K)),
        "bq": jnp.zeros((1, NUM_HEADS * D_K), jnp.float32),
        "wk": xavier(k2, (MODEL_DIM, NUM_HEADS * D_K)),
        "bk": jnp.zeros((1, NUM_HEADS * D_K), jnp.float32),
        "wv": xavier(k3, (MODEL_DIM, NUM_HEADS * D_V)),
        "bv": jnp.zeros((1, NUM_HEADS * D_V), jnp.float32),
        "wo": xavier(k4, (NUM_HEADS * D_V, MODEL_DIM)),
        "bo": jnp.zeros((1, MODEL_DIM), jnp.float32),
    }


if __name__ == "__main__":
    key = jax.random.PRNGKey(0)
    kp, kx = jax.random.split(key)
    params = init_params(kp)

    # Batch of B small graphs with identical topology (self-loop + bidirectional
    # ring) but different node features and edge distances.  B=32 with G=16
    # graphs packed per grid step -> grid=(2,), 128 node / 384 edge columns.
    B, N = 32, 8
    src, tgt = [], []
    for i in range(N):
        src += [i, i, (i + 1) % N]
        tgt += [i, (i + 1) % N, i]
    E = len(src)
    src_idx = jnp.tile(jnp.array(src, jnp.int32)[None, :], (B, 1))   # (B, E)
    tgt_idx = jnp.tile(jnp.array(tgt, jnp.int32)[None, :], (B, 1))   # (B, E)
    dist_edge = 1.0 + (jnp.arange(B * E, dtype=jnp.float32).reshape(B, E) % 3)

    inp = jax.random.normal(kx, (B, N, MODEL_DIM), jnp.float32)

    out, attn_per_head = san_forward(inp, params, src_idx, tgt_idx, dist_edge)
    out = jax.block_until_ready(out)
    attn_per_head = [jax.block_until_ready(a) for a in attn_per_head]

    # Verify against a pure-JAX reference of the PyTorch forward (unfolded math).
    ref_out, ref_attn = san_reference(inp, params, src_idx, tgt_idx, dist_edge)
    assert jnp.allclose(out, ref_out, rtol=1e-5, atol=1e-5), "output mismatch"
    for h in range(NUM_HEADS):
        assert jnp.allclose(attn_per_head[h], ref_attn[:, :, h],
                            rtol=1e-5, atol=1e-5), f"attn head {h} mismatch"

    print("KERNEL_OK")
</pallas_src>

<mosaic_0001>
module attributes {stable_mosaic.version = 11 : i64} {
  func.func @san_kernel(%arg0: i32, %arg1: memref<1x33x128xf32, #tpu.memory_space<vmem>>, %arg2: memref<48x33xf32, #tpu.memory_space<vmem>>, %arg3: memref<32x16xf32, #tpu.memory_space<vmem>>, %arg4: memref<32x1xf32, #tpu.memory_space<vmem>>, %arg5: memref<2x16xf32, #tpu.memory_space<vmem>>, %arg6: memref<16x2xf32, #tpu.memory_space<vmem>>, %arg7: memref<1x3x384xf32, #tpu.memory_space<vmem>>, %arg8: memref<1x384x1xi32, #tpu.memory_space<vmem>>, %arg9: memref<1x32x128xf32, #tpu.memory_space<vmem>>, %arg10: memref<1x2x384xf32, #tpu.memory_space<vmem>>) attributes {dimension_semantics = [#tpu.dimension_semantics<parallel>], iteration_bounds = array<i64: 2>, scalar_prefetch = 0 : i64, scratch_operands = 0 : i64, tpu.core_type = #tpu.core_type<tc>, window_params = [{transform_indices = @transform_0, window_bounds = array<i64: 1, 33, 128>}, {pipeline_mode = #tpu.pipeline_mode<synchronous>, transform_indices = @transform_1, window_bounds = array<i64: 48, 33>}, {pipeline_mode = #tpu.pipeline_mode<synchronous>, transform_indices = @transform_2, window_bounds = array<i64: 32, 16>}, {pipeline_mode = #tpu.pipeline_mode<synchronous>, transform_indices = @transform_3, window_bounds = array<i64: 32, 1>}, {pipeline_mode = #tpu.pipeline_mode<synchronous>, transform_indices = @transform_4, window_bounds = array<i64: 2, 16>}, {pipeline_mode = #tpu.pipeline_mode<synchronous>, transform_indices = @transform_5, window_bounds = array<i64: 16, 2>}, {transform_indices = @transform_6, window_bounds = array<i64: 1, 3, 384>}, {transform_indices = @transform_7, window_bounds = array<i64: 1, 384, 1>}, {transform_indices = @transform_8, window_bounds = array<i64: 1, 32, 128>}, {transform_indices = @transform_9, window_bounds = array<i64: 1, 2, 384>}]} {
    %c0 = arith.constant 0 : index
    %c0_0 = arith.constant 0 : index
    %0 = vector.load %arg2[%c0, %c0_0] : memref<48x33xf32, #tpu.memory_space<vmem>>, vector<48x33xf32>
    %c0_1 = arith.constant 0 : index
    %c0_2 = arith.constant 0 : index
    %c0_3 = arith.constant 0 : index
    %1 = vector.load %arg1[%c0_1, %c0_2, %c0_3] : memref<1x33x128xf32, #tpu.memory_space<vmem>>, vector<1x33x128xf32>
    %2 = vector.shape_cast %1 : vector<1x33x128xf32> to vector<33x128xf32>
    %cst = arith.constant dense<0.000000e+00> : vector<48x128xf32>
    %3 = tpu.matmul %0, %2, %cst {dimension_numbers = #tpu.dot_dimension_numbers<[1], [0], [0], [1], [0, 0, 1, 1], [], []>} : vector<48x33xf32>, vector<33x128xf32>, vector<48x128xf32> -> vector<48x128xf32>
    %4 = vector.extract_strided_slice %3 {offsets = [0, 0], sizes = [16, 128], strides = [1, 1]} : vector<48x128xf32> to vector<16x128xf32>
    %5 = vector.extract_strided_slice %3 {offsets = [16, 0], sizes = [32, 128], strides = [1, 1]} : vector<48x128xf32> to vector<32x128xf32>
    %c0_4 = arith.constant 0 : index
    %c0_5 = arith.constant 0 : index
    %c0_6 = arith.constant 0 : index
    %6 = vector.load %arg7[%c0_4, %c0_5, %c0_6] : memref<1x3x384xf32, #tpu.memory_space<vmem>>, vector<1x1x384xf32>
    %7 = vector.shape_cast %6 : vector<1x1x384xf32> to vector<1x384xf32>
    %8 = arith.fptosi %7 : vector<1x384xf32> to vector<1x384xi32>
    %c0_7 = arith.constant 0 : index
    %c1 = arith.constant 1 : index
    %c0_8 = arith.constant 0 : index
    %9 = vector.load %arg7[%c0_7, %c1, %c0_8] : memref<1x3x384xf32, #tpu.memory_space<vmem>>, vector<1x1x384xf32>
    %10 = vector.shape_cast %9 : vector<1x1x384xf32> to vector<1x384xf32>
    %11 = arith.fptosi %10 : vector<1x384xf32> to vector<1x384xi32>
    %c0_9 = arith.constant 0 : index
    %c2 = arith.constant 2 : index
    %c0_10 = arith.constant 0 : index
    %12 = vector.load %arg7[%c0_9, %c2, %c0_10] : memref<1x3x384xf32, #tpu.memory_space<vmem>>, vector<1x1x384xf32>
    %13 = vector.shape_cast %12 : vector<1x1x384xf32> to vector<1x384xf32>
    %14 = tpu.iota {dimensions = array<i32: 0>} : vector<128x384xi32>
    %15 = vector.broadcast %8 : vector<1x384xi32> to vector<128x384xi32>
    %16 = arith.cmpi eq, %15, %14 : vector<128x384xi32>
    %17 = arith.extui %16 : vector<128x384xi1> to vector<128x384xi32>
    %18 = arith.sitofp %17 : vector<128x384xi32> to vector<128x384xf32>
    %19 = vector.broadcast %11 : vector<1x384xi32> to vector<128x384xi32>
    %20 = arith.cmpi eq, %19, %14 : vector<128x384xi32>
    %21 = arith.extui %20 : vector<128x384xi1> to vector<128x384xi32>
    %22 = arith.sitofp %21 : vector<128x384xi32> to vector<128x384xf32>
    %23 = tpu.iota {dimensions = array<i32: 1>} : vector<384x128xi32>
    %c0_11 = arith.constant 0 : index
    %c0_12 = arith.constant 0 : index
    %c0_13 = arith.constant 0 : index
    %24 = vector.load %arg8[%c0_11, %c0_12, %c0_13] : memref<1x384x1xi32, #tpu.memory_space<vmem>>, vector<1x384x1xi32>
    %25 = vector.shape_cast %24 : vector<1x384x1xi32> to vector<384x1xi32>
    %26 = vector.broadcast %25 : vector<384x1xi32> to vector<384x128xi32>
    %27 = arith.cmpi eq, %26, %23 : vector<384x128xi32>
    %28 = arith.extui %27 : vector<384x128xi1> to vector<384x128xi32>
    %29 = arith.sitofp %28 : vector<384x128xi32> to vector<384x128xf32>
    %cst_14 = arith.constant dense<0.000000e+00> : vector<16x384xf32>
    %30 = tpu.matmul %4, %22, %cst_14 {dimension_numbers = #tpu.dot_dimension_numbers<[1], [0], [0], [1], [0, 0, 1, 1], [], []>} : vector<16x128xf32>, vector<128x384xf32>, vector<16x384xf32> -> vector<16x384xf32>
    %cst_15 = arith.constant dense<0.000000e+00> : vector<32x384xf32>
    %31 = tpu.matmul %5, %18, %cst_15 {dimension_numbers = #tpu.dot_dimension_numbers<[1], [0], [0], [1], [0, 0, 1, 1], [], []>} : vector<32x128xf32>, vector<128x384xf32>, vector<32x384xf32> -> vector<32x384xf32>
    %32 = vector.extract_strided_slice %31 {offsets = [0, 0], sizes = [16, 384], strides = [1, 1]} : vector<32x384xf32> to vector<16x384xf32>
    %33 = vector.extract_strided_slice %31 {offsets = [16, 0], sizes = [16, 384], strides = [1, 1]} : vector<32x384xf32> to vector<16x384xf32>
    %c0_16 = arith.constant 0 : index
    %c0_17 = arith.constant 0 : index
    %34 = vector.load %arg5[%c0_16, %c0_17] : memref<2x16xf32, #tpu.memory_space<vmem>>, vector<2x16xf32>
    %35 = arith.mulf %30, %32 : vector<16x384xf32>
    %cst_18 = arith.constant dense<0.000000e+00> : vector<2x384xf32>
    %36 = tpu.matmul %34, %35, %cst_18 {dimension_numbers = #tpu.dot_dimension_numbers<[1], [0], [0], [1], [0, 0, 1, 1], [], []>} : vector<2x16xf32>, vector<16x384xf32>, vector<2x384xf32> -> vector<2x384xf32>
    %37 = vector.shape_cast %36 : vector<2x384xf32> to vector<1x2x384xf32>
    %cst_19 = arith.constant dense<0xFF800000> : vector<1xf32>
    %38 = vector.multi_reduction <maximumf>, %37, %cst_19 [1, 2] : vector<1x2x384xf32> to vector<1xf32>
    %39 = vector.shape_cast %38 : vector<1xf32> to vector<1x1x1xf32>
    %40 = vector.extract %39[0, 0, 0] : f32 from vector<1x1x1xf32>
    %41 = vector.broadcast %40 : f32 to vector<2x384xf32>
    %42 = arith.subf %36, %41 : vector<2x384xf32>
    %43 = math.exp %42 : vector<2x384xf32>
    %44 = vector.broadcast %13 : vector<1x384xf32> to vector<2x384xf32>
    %45 = arith.divf %43, %44 : vector<2x384xf32>
    %cst_20 = arith.constant dense<0.000000e+00> : vector<2x128xf32>
    %46 = tpu.matmul %45, %29, %cst_20 {dimension_numbers = #tpu.dot_dimension_numbers<[1], [0], [0], [1], [0, 0, 1, 1], [], []>} : vector<2x384xf32>, vector<384x128xf32>, vector<2x128xf32> -> vector<2x128xf32>
    %cst_21 = arith.constant dense<0.000000e+00> : vector<2x384xf32>
    %47 = tpu.matmul %46, %22, %cst_21 {dimension_numbers = #tpu.dot_dimension_numbers<[1], [0], [0], [1], [0, 0, 1, 1], [], []>} : vector<2x128xf32>, vector<128x384xf32>, vector<2x384xf32> -> vector<2x384xf32>
    %48 = arith.divf %45, %47 : vector<2x384xf32>
    %c0_22 = arith.constant 0 : index
    %c0_23 = arith.constant 0 : index
    %c0_24 = arith.constant 0 : index
    %49 = vector.load %arg10[%c0_22, %c0_23, %c0_24] : memref<1x2x384xf32, #tpu.memory_space<vmem>>, vector<1x2x384xf32>
    %50 = vector.shape_cast %49 : vector<1x2x384xf32> to vector<2x384xf32>
    %51 = vector.shape_cast %48 : vector<2x384xf32> to vector<1x2x384xf32>
    tpu.vector_store %arg10[%c0_22, %c0_23, %c0_24], %51 {strides = array<i32>} : memref<1x2x384xf32, #tpu.memory_space<vmem>>, vector<1x2x384xf32>,
    %c0_25 = arith.constant 0 : index
    %c0_26 = arith.constant 0 : index
    %52 = vector.load %arg6[%c0_25, %c0_26] : memref<16x2xf32, #tpu.memory_space<vmem>>, vector<16x2xf32>
    %cst_27 = arith.constant dense<0.000000e+00> : vector<16x384xf32>
    %53 = tpu.matmul %52, %48, %cst_27 {dimension_numbers = #tpu.dot_dimension_numbers<[1], [0], [0], [1], [0, 0, 1, 1], [], []>} : vector<16x2xf32>, vector<2x384xf32>, vector<16x384xf32> -> vector<16x384xf32>
    %54 = arith.mulf %33, %53 : vector<16x384xf32>
    %cst_28 = arith.constant dense<0.000000e+00> : vector<16x128xf32>
    %55 = tpu.matmul %54, %29, %cst_28 {dimension_numbers = #tpu.dot_dimension_numbers<[1], [0], [0], [1], [0, 0, 1, 1], [], []>} : vector<16x384xf32>, vector<384x128xf32>, vector<16x128xf32> -> vector<16x128xf32>
    %c0_29 = arith.constant 0 : index
    %c0_30 = arith.constant 0 : index
    %56 = vector.load %arg3[%c0_29, %c0_30] : memref<32x16xf32, #tpu.memory_space<vmem>>, vector<32x16xf32>
    %cst_31 = arith.constant dense<0.000000e+00> : vector<32x128xf32>
    %57 = tpu.matmul %56, %55, %cst_31 {dimension_numbers = #tpu.dot_dimension_numbers<[1], [0], [0], [1], [0, 0, 1, 1], [], []>} : vector<32x16xf32>, vector<16x128xf32>, vector<32x128xf32> -> vector<32x128xf32>
    %c0_32 = arith.constant 0 : index
    %c0_33 = arith.constant 0 : index
    %58 = vector.load %arg4[%c0_32, %c0_33] : memref<32x1xf32, #tpu.memory_space<vmem>>, vector<32x1xf32>
    %59 = vector.broadcast %58 : vector<32x1xf32> to vector<32x128xf32>
    %60 = arith.addf %57, %59 : vector<32x128xf32>
    %c0_34 = arith.constant 0 : index
    %c0_35 = arith.constant 0 : index
    %c0_36 = arith.constant 0 : index
    %61 = vector.load %arg9[%c0_34, %c0_35, %c0_36] : memref<1x32x128xf32, #tpu.memory_space<vmem>>, vector<1x32x128xf32>
    %62 = vector.shape_cast %61 : vector<1x32x128xf32> to vector<32x128xf32>
    %63 = vector.shape_cast %60 : vector<32x128xf32> to vector<1x32x128xf32>
    tpu.vector_store %arg9[%c0_34, %c0_35, %c0_36], %63 {strides = array<i32>} : memref<1x32x128xf32, #tpu.memory_space<vmem>>, vector<1x32x128xf32>,
    return
  }
  func.func @transform_0(%arg0: i32) -> (i32, i32, i32) {
    %c0_i32 = arith.constant 0 : i32
    %c0_i32_0 = arith.constant 0 : i32
    %c0_i32_1 = arith.constant 0 : i32
    return %arg0, %c0_i32, %c0_i32_0 : i32, i32, i32
  }
  func.func @transform_1(%arg0: i32) -> (i32, i32) {
    %c0_i32 = arith.constant 0 : i32
    %c0_i32_0 = arith.constant 0 : i32
    %c0_i32_1 = arith.constant 0 : i32
    return %c0_i32, %c0_i32_0 : i32, i32
  }
  func.func @transform_2(%arg0: i32) -> (i32, i32) {
    %c0_i32 = arith.constant 0 : i32
    %c0_i32_0 = arith.constant 0 : i32
    %c0_i32_1 = arith.constant 0 : i32
    return %c0_i32, %c0_i32_0 : i32, i32
  }
  func.func @transform_3(%arg0: i32) -> (i32, i32) {
    %c0_i32 = arith.constant 0 : i32
    %c0_i32_0 = arith.constant 0 : i32
    %c0_i32_1 = arith.constant 0 : i32
    return %c0_i32, %c0_i32_0 : i32, i32
  }
  func.func @transform_4(%arg0: i32) -> (i32, i32) {
    %c0_i32 = arith.constant 0 : i32
    %c0_i32_0 = arith.constant 0 : i32
    %c0_i32_1 = arith.constant 0 : i32
    return %c0_i32, %c0_i32_0 : i32, i32
  }
  func.func @transform_5(%arg0: i32) -> (i32, i32) {
    %c0_i32 = arith.constant 0 : i32
    %c0_i32_0 = arith.constant 0 : i32
    %c0_i32_1 = arith.constant 0 : i32
    return %c0_i32, %c0_i32_0 : i32, i32
  }
  func.func @transform_6(%arg0: i32) -> (i32, i32, i32) {
    %c0_i32 = arith.constant 0 : i32
    %c0_i32_0 = arith.constant 0 : i32
    %c0_i32_1 = arith.constant 0 : i32
    return %arg0, %c0_i32, %c0_i32_0 : i32, i32, i32
  }
  func.func @transform_7(%arg0: i32) -> (i32, i32, i32) {
    %c0_i32 = arith.constant 0 : i32
    %c0_i32_0 = arith.constant 0 : i32
    %c0_i32_1 = arith.constant 0 : i32
    return %arg0, %c0_i32, %c0_i32_0 : i32, i32, i32
  }
  func.func @transform_8(%arg0: i32) -> (i32, i32, i32) {
    %c0_i32 = arith.constant 0 : i32
    %c0_i32_0 = arith.constant 0 : i32
    %c0_i32_1 = arith.constant 0 : i32
    return %arg0, %c0_i32, %c0_i32_0 : i32, i32, i32
  }
  func.func @transform_9(%arg0: i32) -> (i32, i32, i32) {
    %c0_i32 = arith.constant 0 : i32
    %c0_i32_0 = arith.constant 0 : i32
    %c0_i32_1 = arith.constant 0 : i32
    return %arg0, %c0_i32, %c0_i32_0 : i32, i32, i32
  }
}

</mosaic_0001>

<bundles_post_ra>
// kernel: tpu_custom_call.1
= control target key start
LH: loop header
LB: loop body
LE: loop exit
PB: predicated region body
PF: predicated region fallthrough
CT: control target
= control target key end

     0   :  { %s5334_s0 = inlined_call_operand.vmem [shape: f32[2,33,128], index: 0, kind: input, shape index: {}]   ;;  %s5335_s1 = inlined_call_operand.vmem [shape: f32[48,33], index: 1, kind: input, shape index: {}]   ;;  %s5336_s2 = inlined_call_operand.vmem [shape: f32[32,16], index: 2, kind: input, shape index: {}]   ;;  %s5337_s3 = inlined_call_operand.vmem [shape: f32[32,1], index: 3, kind: input, shape index: {}]   ;;  %s5338_s4 = inlined_call_operand.vmem [shape: f32[2,16], index: 4, kind: input, shape index: {}]   ;;  %s5339_s5 = inlined_call_operand.vmem [shape: f32[16,2], index: 5, kind: input, shape index: {}]   ;;  %s5340_s6 = inlined_call_operand.vmem [shape: f32[2,3,384], index: 6, kind: input, shape index: {}]   ;;  %s5341_s7 = inlined_call_operand.vmem [shape: s32[2,384,1], index: 7, kind: input, shape index: {}]   ;;  %s5342_s8 = inlined_call_operand.hbm [shape: f32[2,32,128], index: 8, kind: output, shape index: {0}]   ;;  %s5343_s9 = inlined_call_operand.hbm [shape: f32[2,2,384], index: 9, kind: output, shape index: {1}]  }
   0x1   :  { %5393 = sst [smem:[#allocation17_spill]] %s5334_s0 }
   0x2   :  { %15 = vsyncpa [#allocation3], 0 }
   0x3   :  { %17 = vsyncpa [#allocation3 + $0x1], 0 }
   0x4   :  { %18 = vsyncpa [#allocation5], 0 }
   0x5   :  { %20 = vsyncpa [#allocation5 + $0x1], 0  ;;  %s4009_s30 = smov 0   ;;  %s4011_s10 = smov 0  }
   0x6   :  { %s4013_s11 = smov 0   ;;  %s4015_s12 = smov 0  }
   0x7 LB: > { %s4030_s13 = sadd.s32 4294967295, %s3947_s12   ;;  %s2621_s14 = sadd.s32 4294967294, %s3947_s12   ;;  %s3947_s12 = sphi %s4015_s12, %s5575_s12   ;;  %s3943_s11 = sphi %s4013_s11, %s5574_s11   ;;  %s3939_s10 = sphi %s4011_s10, %s5573_s10   ;;  %s3935_s30 = sphi %s4009_s30, %s5572_s30  }
   0x8   : > { %s4034_s15 = sadd.s32 1, %s3947_s12   ;;  %s216_s16 = sadd.s32 1, %s3943_s11 }
   0x9   : > { %s213_s17 = ssub.s32 %s3947_s12, %s4034_s15  ;;  %p226_p0 = scmp.ne.s32.totalorder %s3943_s11, %s3939_s10 }
   0xa   : > { %p214_p1 = scmp.eq.s32.totalorder %s213_s17, 0  ;;  %p227_p2 = scmp.eq.s32.totalorder %s4030_s13, 1 }
   0xb   : > { %p232_p3 = scmp.ne.s32.totalorder %s3939_s10, %s3935_s30  ;;  %p233_p4 = scmp.eq.s32.totalorder %s2621_s14, 1 }
   0xc   : > { %s4045_s18 = scalar_select %p214_p1, %s3943_s11, %s216_s16  }
   0xd   : > { %p4047_p5 = por %p227_p2, %p226_p0  ;;  %p4051_p6 = por %p233_p4, %p232_p3 }
   0xe   : > { %p2624_p7 = scmp.ge.s32.totalorder %s3947_s12, 1  ;;  %p316_p8 = scmp.lt.s32.totalorder %s3947_s12, 3 }
  0x10   : > { %p317_p9 = pnand %p2624_p7, %p316_p8 }
  0x12   : > { %320 = sbr.rel (%p317_p9) target bundleno = 2081 (0x821), region = 52 }
  0x19   : > { %p367_p10 = scmp.lt.s32.totalorder %s4030_s13, 1  ;;  %v382_v0 = vld [vmem:[%s5335_s1] sm:$0xff]  ;;  %vm393_vm0 = vcmask 269312   ;;  %v518_v1 = vlaneseq  ;;  %s5396_s0 = sld [smem:[#allocation17_spill]]  ;;  %vm412_vm1 = vcmask 1040384   ;;  %v5397_v24 = vmov 0 }
  0x1a   : > { %3238 = vmatprep.mubr.msk.f32.mxu0 %vm393_vm0, %v382_v0  ;;  %v383_v25 = vld [vmem:[%s5335_s1 + $0x8] sm:$0xff]  ;;  %v384_v27 = vld [vmem:[%s5335_s1 + $0x10] sm:$0xff]  ;;  %v3949_v28 = vmov 1.0|1.0   ;;  %v5401_v29 = vmov 0  ;;  %v5403_v32 = vmov 0 }
  0x1b   : > { %s4063_s23 = scalar_select %p367_p10, %s4030_s13, 1  ;;  %v4068_v2 = vshrl.u32 %v518_v1, 7  ;;  %v5405_v33 = vmov 0  ;;  %v385_v34 = vld [vmem:[%s5335_s1 + $0x18] sm:$0xff]  ;;  %v5407_v35 = vmov 0  ;;  %v5409_v36 = vmov 0 }
  0x1c   : > { %v5411_v39 = vmov 0  ;;  %v5413_v40 = vmov 0  ;;  %v386_v41 = vld [vmem:[%s5335_s1 + $0x20] sm:$0xff]  ;;  %v5415_v42 = vmov 0  ;;  %v387_v43 = vld [vmem:[%s5335_s1 + $0x28] sm:$0xff]  ;;  %v5417_v46 = vmov 0 }
  0x1d   : > { %s3771_s24 = smul.u32 40, %s4063_s23  ;;  %v4080_v9 = vsub.s32 0, %v4068_v2  ;;  %v4083_v11 = vsub.s32 1, %v4068_v2  ;;  %v4086_v12 = vsub.s32 2, %v4068_v2  ;;  %v4089_v15 = vadd.s32 8, %v4068_v2 }
  0x1e   : > { %s3772_s25 = smul.u32 12, %s4063_s23  ;;  %v4095_v18 = vadd.s32 16, %v4068_v2  ;;  %v4098_v19 = vadd.s32 24, %v4068_v2  ;;  %v4111_v22 = vadd.s32 32, %v4068_v2  ;;  %v4114_v23 = vadd.s32 40, %v4068_v2 }
  0x1f   : > { %s371_s28 = scalar_lea.vmem %s5396_s0, %s3771_s24  ;;  %v4159_v30 = vadd.s32 48, %v4068_v2  ;;  %v4162_v31 = vadd.s32 56, %v4068_v2  ;;  %v4233_v37 = vadd.s32 64, %v4068_v2  ;;  %v4236_v38 = vadd.s32 72, %v4068_v2  ;;  %s3773_s17 = smul.u32 384, %s4063_s23 }
  0x20   : > { %s4076_s16 = scalar_lea.vmem %s5340_s6, %s3772_s25  ;;  %v388_v3 = vld [vmem:[%s371_s28] sm:$0xff]  ;;  %v389_v4 = vld [vmem:[%s371_s28 + $0x8] sm:$0xff]  ;;  %v390_v5 = vld [vmem:[%s371_s28 + $0x10] sm:$0xff]  ;;  %v4288_v44 = vadd.s32 80, %v4068_v2  ;;  %v4291_v45 = vadd.s32 88, %v4068_v2  ;;  %v5419_v47 = vmov 0 }
  0x21   : > { %v3447_v6 = vpack.c.bf16 %v389_v4, %v388_v3  ;;  %v2636_v7 = vld [vmem:[%s4076_s16 + $0x1] ss:$4 sm:$0x7]  ;;  %v391_v10 = vld [vmem:[%s371_s28 + $0x18] sm:$0xff]  ;;  %v392_v17 = vld [vmem:[%s371_s28 + $0x20] sm:$0x1]  ;;  %s4693_s24 = scalar_lea.vmem %s5341_s7, %s3773_s17 }
  0x22   : > { %v3776_v8 = vtrunc.f32 %v2636_v7  ;;  %v3451_v13 = vpack.c.bf16 %v391_v10, %v390_v5  ;;  %v5421_v48 = vmov 0  ;;  %v4332_v49 = vadd.s32 96, %v4068_v2  ;;  %v511_v0 = vld [vmem:[%s4076_s16] ss:$4 sm:$0x7]  ;;  %s5121_s25 = sand.u32 1, %s3939_s10  }
  0x23   : > { %3448 = vmatprep.subr.bf16.mxu0 %v3447_v6  ;;  %v4335_v50 = vadd.s32 104, %v4068_v2  ;;  %v5423_v51 = vmov 0  ;;  %v5425_v52 = vmov 0  ;;  %v5427_v53 = vmov 0  ;;  %s3770_s28 = smul.u32 6, %s5121_s25  ;;  %s2476_s22 = scalar_lea.sflag [#allocation5], %s5121_s25 }
  0x24   : > { %v3777_v14 = vcvt.f32.s32 %v3776_v8  ;;  %3450 = vmatpush3.bf16.msra.mxu0 %v3447_v6  ;;  %v4374_v54 = vadd.s32 112, %v4068_v2  ;;  %v4377_v55 = vadd.s32 120, %v4068_v2  ;;  %v5429_v56 = vmov 0  ;;  %v871_v8 = vld [vmem:[%s4693_s24 + $0xb0] sm:$0xff]  ;;  %s3780_s27 = smul.u32 96, %s4030_s13 }
  0x25   : > { %3452 = vmatprep.subr.bf16.mxu0 %v3451_v13  ;;  %v5431_v57 = vmov 0  ;;  %v5433_v58 = vmov 0  ;;  %v5435_v59 = vmov 0  ;;  %v5437_v60 = vmov 0  ;;  %s5156_s29 = scalar_lea.vmem [#allocation4], %s3770_s28 }
  0x26   : > { %v4092_v16 = vrot.slane %v3777_v14, %v4080_v9  ;;  %v4101_v20 = vrot.slane %v3777_v14, %v4083_v11  ;;  %v4104_v21 = vrot.slane %v3777_v14, %v4086_v12  ;;  %v5439_v61 = vmov 0  ;;  %s5263_s17 = scalar_lea.hbm %s5343_s9, %s3780_s27  ;;  %s2506_s21 = sshll.u32 %s5156_s29, 4  ;;  %s2507_s21 = int_to_ptr.vmem [resolvable:$true] %s2506_s21 }
  0x27   : > { %v5441_v62 = vmov 0  ;;  %v5443_v63 = vmov 0  ;;  %v3774_v3 = vtrunc.f32 %v511_v0  ;;  %v5367_v7 = vmov 0.0   ;;  %v852_v0 = vld [vmem:[%s4693_s24 + $0x18] sm:$0xff] }
  0x28   : > { %3454 = vmatpush3.bf16.msra.mxu0 %v3451_v13  ;;  %vm703_vm2 = vcmp.eq.s32.totalorder %v4092_v16, %v4068_v2  ;;  %vm706_vm3 = vcmp.eq.s32.totalorder %v4092_v16, %v4089_v15  ;;  %vm704_vm4 = vcmp.eq.s32.totalorder %v4101_v20, %v4068_v2  ;;  %vm707_vm5 = vcmp.eq.s32.totalorder %v4101_v20, %v4089_v15 }
  0x29   : > { %3236 = vmatprep.subr.msk.mxu0 %vm412_vm1, %v392_v17  ;;  %vm4121_vm6 = vmpackc.low %vm706_vm3, %vm703_vm2  ;;  %vm705_vm7 = vcmp.eq.s32.totalorder %v4104_v21, %v4068_v2  ;;  %vm708_vm8 = vcmp.eq.s32.totalorder %v4104_v21, %v4089_v15  ;;  %vm710_vm10 = vcmp.eq.s32.totalorder %v4101_v20, %v4095_v18  ;;  %vm713_vm11 = vcmp.eq.s32.totalorder %v4101_v20, %v4098_v19 }
  0x2a   : > { %v5398_v24 = vsel %vm4121_vm6, 4294967295, %v5397_v24  ;;  %vm4132_vm9 = vmpackc.low %vm707_vm5, %vm704_vm4  ;;  %vm709_vm12 = vcmp.eq.s32.totalorder %v4092_v16, %v4095_v18  ;;  %vm712_vm13 = vcmp.eq.s32.totalorder %v4092_v16, %v4098_v19  ;;  %vm711_vm15 = vcmp.eq.s32.totalorder %v4104_v21, %v4095_v18  ;;  %1249 = vmatprep.mubr.f32.mxu1 %v5367_v7 }
  0x2b   : > { %3456 = vmatprep.subr.msk.bf16.mxu1 %vm4132_vm9, %v3949_v28  ;;  %vm4150_vm14 = vmpackc.low %vm708_vm8, %vm705_vm7  ;;  %vm714_vm2 = vcmp.eq.s32.totalorder %v4104_v21, %v4098_v19  ;;  %vm716_vm4 = vcmp.eq.s32.totalorder %v4101_v20, %v4111_v22  ;;  %vm719_vm5 = vcmp.eq.s32.totalorder %v4101_v20, %v4114_v23  ;;  %vm715_vm7 = vcmp.eq.s32.totalorder %v4092_v16, %v4111_v22 }
  0x2c   : > { %v5402_v29 = vsel %vm4150_vm14, 4294967295, %v5401_v29  ;;  %3237 = vmatpush3.msk.msra.mxu0 %vm412_vm1, %v392_v17  ;;  %3458 = vmatpush1.bf16.msk.msra.mxu1 %vm4121_vm6, %v3949_v28  ;;  %vm4168_vm3 = vmpackc.low %vm713_vm11, %vm710_vm10  ;;  %vm718_vm8 = vcmp.eq.s32.totalorder %v4092_v16, %v4114_v23  ;;  %vm717_vm11 = vcmp.eq.s32.totalorder %v4104_v21, %v4111_v22  ;;  %v3775_v4 = vcvt.f32.s32 %v3774_v3  ;;  %v869_v3 = vld [vmem:[%s4693_s24 + $0xa0] sm:$0xff] }
  0x2d   : > { %v5404_v32 = vsel %vm4168_vm3, 4294967295, %v5403_v32  ;;  %3239 = vmatmul.mubr.msk.f32.vlgmr.msra.gmra.mrb[0].mxu0 %vm393_vm0, %v383_v25  ;;  %3488 = vmatprep.subr.msk.bf16.mxu0 %vm4150_vm14, %v3949_v28  ;;  %vm4186_vm1 = vmpackc.low %vm712_vm13, %vm709_vm12  ;;  %vm720_vm12 = vcmp.eq.s32.totalorder %v4104_v21, %v4114_v23 }
  0x2e   : > { %v5406_v33 = vsel %vm4186_vm1, 4294967295, %v5405_v33  ;;  %3241 = vmatprep.mubr.msk.f32.mxu0 %vm393_vm0, %v384_v27  ;;  %3490 = vmatpush3.bf16.msk.msra.mxu0 %vm4150_vm14, %v3949_v28  ;;  %vm4207_vm10 = vmpackc.low %vm714_vm2, %vm711_vm15  ;;  %vm722_vm15 = vcmp.eq.s32.totalorder %v4101_v20, %v4159_v30  ;;  %vm725_vm2 = vcmp.eq.s32.totalorder %v4101_v20, %v4162_v31  ;;  %v4475_v5 = vrot.slane %v3775_v4, %v4083_v11 }
  0x2f   : > { %v5408_v35 = vsel %vm4207_vm10, 4294967295, %v5407_v35  ;;  %3460 = vmatprep.subr.msk.bf16.mxu1 %vm4168_vm3, %v3949_v28  ;;  %3492 = vmatprep.subr.msk.bf16.mxu0 %vm4207_vm10, %v3949_v28  ;;  %vm4224_vm13 = vmpackc.low %vm719_vm5, %vm716_vm4  ;;  %vm726_vm3 = vcmp.eq.s32.totalorder %v4104_v21, %v4162_v31  ;;  %v4478_v6 = vrot.slane %v3775_v4, %v4086_v12  ;;  %v4498_v10 = vrot.slane %v3775_v4, %v4080_v9  ;;  %v870_v4 = vld [vmem:[%s4693_s24 + $0xa8] sm:$0xff] }
  0x30   : > { %v5410_v36 = vsel %vm4224_vm13, 4294967295, %v5409_v36  ;;  %3462 = vmatpush1.bf16.msk.msra.mxu1 %vm4186_vm1, %v3949_v28  ;;  %vm4247_vm4 = vmpackc.low %vm718_vm8, %vm715_vm7  ;;  %vm723_vm1 = vcmp.eq.s32.totalorder %v4104_v21, %v4159_v30  ;;  %vm721_vm8 = vcmp.eq.s32.totalorder %v4092_v16, %v4159_v30  ;;  %vm590_vm6 = vcmp.eq.s32.totalorder %v4475_v5, %v4374_v54 }
  0x31   : > { %v5412_v39 = vsel %vm4247_vm4, 4294967295, %v5411_v39  ;;  %3242 = vmatmul.mubr.msk.f32.gmra.mrb[2].mxu0 %vm393_vm0, %v385_v34  ;;  %3464 = vmatprep.subr.msk.bf16.mxu1 %vm4224_vm13, %v3949_v28  ;;  %vm4255_vm5 = vmpackc.low %vm720_vm12, %vm717_vm11  ;;  %vm724_vm11 = vcmp.eq.s32.totalorder %v4092_v16, %v4162_v31  ;;  %vm728_vm12 = vcmp.eq.s32.totalorder %v4101_v20, %v4233_v37  ;;  %v5382_v27 = vmov 0.0|0.0   ;;  %v849_v34 = vld [vmem:[%s4693_s24] sm:$0xff] }
  0x32   : > { %v5414_v40 = vsel %vm4255_vm5, 4294967295, %v5413_v40  ;;  %3494 = vmatpush3.bf16.msk.msra.mxu0 %vm4207_vm10, %v3949_v28  ;;  %vm4269_vm7 = vmpackc.low %vm725_vm2, %vm722_vm15  ;;  %vm731_vm15 = vcmp.eq.s32.totalorder %v4101_v20, %v4236_v38  ;;  %3244 = vmatprep.mubr.msk.f32.mxu0 %vm393_vm0, %v386_v41  ;;  %vm729_vm10 = vcmp.eq.s32.totalorder %v4104_v21, %v4233_v37  ;;  %v884_v41 = vld [vmem:[%s4693_s24 + $0x118] sm:$0xff] }
  0x33   : > { %v5416_v42 = vsel %vm4269_vm7, 4294967295, %v5415_v42  ;;  %3496 = vmatprep.subr.msk.bf16.mxu0 %vm4255_vm5, %v3949_v28  ;;  %vm4296_vm2 = vmpackc.low %vm726_vm3, %vm723_vm1  ;;  %vm727_vm1 = vcmp.eq.s32.totalorder %v4092_v16, %v4233_v37 }
  0x34   : > { %3466 = vmatpush1.bf16.msk.msra.mxu1 %vm4247_vm4, %v3949_v28  ;;  %v5418_v46 = vsel %vm4296_vm2, 4294967295, %v5417_v46  ;;  %vm4304_vm13 = vmpackc.low %vm724_vm11, %vm721_vm8  ;;  %vm732_vm4 = vcmp.eq.s32.totalorder %v4104_v21, %v4236_v38  ;;  %vm730_vm8 = vcmp.eq.s32.totalorder %v4092_v16, %v4236_v38  ;;  %vm737_vm11 = vcmp.eq.s32.totalorder %v4101_v20, %v4291_v45 }
  0x35   : > { %3468 = vmatprep.subr.msk.bf16.mxu1 %vm4269_vm7, %v3949_v28  ;;  %v5420_v47 = vsel %vm4304_vm13, 4294967295, %v5419_v47  ;;  %3245 = vmatmul.mubr.msk.f32.gmra.mrb[4].mxu0 %vm393_vm0, %v387_v43  ;;  %vm4316_vm3 = vmpackc.low %vm731_vm15, %vm728_vm12  ;;  %vm734_vm0 = vcmp.eq.s32.totalorder %v4101_v20, %v4288_v44  ;;  %vm735_vm7 = vcmp.eq.s32.totalorder %v4104_v21, %v4288_v44  ;;  %v867_v43 = vld [vmem:[%s4693_s24 + $0x90] sm:$0xff] }
  0x36   : > { %3498 = vmatpush3.bf16.msk.msra.mxu0 %vm4255_vm5, %v3949_v28  ;;  %v5422_v48 = vsel %vm4316_vm3, 4294967295, %v5421_v48  ;;  %vm4340_vm12 = vmpackc.low %vm732_vm4, %vm729_vm10  ;;  %vm738_vm5 = vcmp.eq.s32.totalorder %v4104_v21, %v4291_v45  ;;  %vm733_vm4 = vcmp.eq.s32.totalorder %v4092_v16, %v4288_v44 }
  0x37   : > { %3500 = vmatprep.subr.msk.bf16.mxu0 %vm4296_vm2, %v3949_v28  ;;  %v5424_v51 = vsel %vm4340_vm12, 4294967295, %v5423_v51  ;;  %vm4347_vm15 = vmpackc.low %vm730_vm8, %vm727_vm1  ;;  %vm736_vm1 = vcmp.eq.s32.totalorder %v4092_v16, %v4291_v45  ;;  %vm740_vm8 = vcmp.eq.s32.totalorder %v4101_v20, %v4332_v49 }
  0x38   : > { %3470 = vmatpush1.bf16.msk.msra.mxu1 %vm4304_vm13, %v3949_v28  ;;  %v5426_v52 = vsel %vm4347_vm15, 4294967295, %v5425_v52  ;;  %vm4358_vm10 = vmpackc.low %vm737_vm11, %vm734_vm0  ;;  %vm744_vm13 = vcmp.eq.s32.totalorder %v4104_v21, %v4335_v50 }
  0x39   : > { %3472 = vmatprep.subr.msk.bf16.mxu1 %vm4316_vm3, %v3949_v28  ;;  %v5428_v53 = vsel %vm4358_vm10, 4294967295, %v5427_v53  ;;  %vm743_vm3 = vcmp.eq.s32.totalorder %v4101_v20, %v4335_v50  ;;  %vm4382_vm0 = vmpackc.low %vm738_vm5, %vm735_vm7  ;;  %vm739_vm7 = vcmp.eq.s32.totalorder %v4092_v16, %v4332_v49 }
  0x3a   : > { %3502 = vmatpush3.bf16.msk.msra.mxu0 %vm4296_vm2, %v3949_v28  ;;  %v5430_v56 = vsel %vm4382_vm0, 4294967295, %v5429_v56  ;;  %vm4389_vm11 = vmpackc.low %vm736_vm1, %vm733_vm4  ;;  %vm741_vm2 = vcmp.eq.s32.totalorder %v4104_v21, %v4332_v49  ;;  %vm742_vm4 = vcmp.eq.s32.totalorder %v4092_v16, %v4335_v50  ;;  %vm746_vm1 = vcmp.eq.s32.totalorder %v4101_v20, %v4374_v54 }
  0x3b   : > { %3504 = vmatprep.subr.msk.bf16.mxu0 %vm4340_vm12, %v3949_v28  ;;  %v5432_v57 = vsel %vm4389_vm11, 4294967295, %v5431_v57  ;;  %vm4400_vm5 = vmpackc.low %vm743_vm3, %vm740_vm8 }
  0x3c   : > { %3474 = vmatpush1.bf16.msk.msra.mxu1 %vm4347_vm15, %v3949_v28  ;;  %v5434_v58 = vsel %vm4400_vm5, 4294967295, %v5433_v58  ;;  %vm4418_vm3 = vmpackc.low %vm744_vm13, %vm741_vm2  ;;  %vm750_vm15 = vcmp.eq.s32.totalorder %v4104_v21, %v4377_v55  ;;  %vm745_vm2 = vcmp.eq.s32.totalorder %v4092_v16, %v4374_v54 }
  0x3d   : > { %3476 = vmatprep.subr.msk.bf16.mxu1 %vm4358_vm10, %v3949_v28  ;;  %vm749_vm10 = vcmp.eq.s32.totalorder %v4101_v20, %v4377_v55  ;;  %v5436_v59 = vsel %vm4418_vm3, 4294967295, %v5435_v59  ;;  %vm4425_vm8 = vmpackc.low %vm742_vm4, %vm739_vm7  ;;  %vm748_vm7 = vcmp.eq.s32.totalorder %v4092_v16, %v4377_v55  ;;  %v887_v16 = vld [vmem:[%s4693_s24 + $0x130] sm:$0xff] }
  0x3e   : > { %3506 = vmatpush3.bf16.msk.msra.mxu0 %vm4340_vm12, %v3949_v28  ;;  %v5438_v60 = vsel %vm4425_vm8, 4294967295, %v5437_v60  ;;  %vm747_vm12 = vcmp.eq.s32.totalorder %v4104_v21, %v4374_v54  ;;  %vm4436_vm13 = vmpackc.low %vm749_vm10, %vm746_vm1 }
  0x3f   : > { %3508 = vmatprep.subr.msk.bf16.mxu0 %vm4382_vm0, %v3949_v28  ;;  %v5440_v61 = vsel %vm4436_vm13, 4294967295, %v5439_v61  ;;  %vm4450_vm4 = vmpackc.low %vm750_vm15, %vm747_vm12  ;;  %vm548_vm12 = vcmp.eq.s32.totalorder %v4475_v5, %v4068_v2  ;;  %vm551_vm15 = vcmp.eq.s32.totalorder %v4475_v5, %v4089_v15 }
  0x40   : > { %3478 = vmatpush1.bf16.msk.msra.mxu1 %vm4389_vm11, %v3949_v28  ;;  %v5442_v62 = vsel %vm4450_vm4, 4294967295, %v5441_v62  ;;  %vm4457_vm10 = vmpackc.low %vm748_vm7, %vm745_vm2  ;;  %vm549_vm2 = vcmp.eq.s32.totalorder %v4478_v6, %v4068_v2  ;;  %vm552_vm7 = vcmp.eq.s32.totalorder %v4478_v6, %v4089_v15  ;;  %vm568_vm11 = vcmp.eq.s32.totalorder %v4498_v10, %v4162_v31 }
  0x41   : > { %3480 = vmatprep.subr.msk.bf16.mxu1 %vm4400_vm5, %v3949_v28  ;;  %v5444_v63 = vsel %vm4457_vm10, 4294967295, %v5443_v63  ;;  %vm3519_vm1 = vmpackc.low %vm551_vm15, %vm548_vm12  ;;  %vm547_vm12 = vcmp.eq.s32.totalorder %v4498_v10, %v4068_v2  ;;  %vm550_vm15 = vcmp.eq.s32.totalorder %v4498_v10, %v4089_v15  ;;  %vm556_vm5 = vcmp.eq.s32.totalorder %v4498_v10, %v4098_v19  ;;  %v857_v15 = vld [vmem:[%s4693_s24 + $0x40] sm:$0xff] }
  0x42   : > { %3510 = vmatpush3.bf16.msk.msra.mxu0 %vm4382_vm0, %v3949_v28 }
  0x43   : > { %3512 = vmatprep.subr.msk.bf16.mxu0 %vm4418_vm3, %v3949_v28 }
  0x44   : > { %3482 = vmatpush1.bf16.msk.msra.mxu1 %vm4425_vm8, %v3949_v28  ;;  %vm553_vm8 = vcmp.eq.s32.totalorder %v4498_v10, %v4095_v18 }
  0x45   : > { %3484 = vmatprep.subr.msk.bf16.mxu1 %vm4436_vm13, %v3949_v28  ;;  %vm3521_vm13 = vmpackc.low %vm550_vm15, %vm547_vm12  ;;  %vm560_vm12 = vcmp.eq.s32.totalorder %v4475_v5, %v4111_v22  ;;  %vm563_vm15 = vcmp.eq.s32.totalorder %v4475_v5, %v4114_v23 }
  0x46   : > { %3514 = vmatpush3.bf16.msk.msra.mxu0 %vm4418_vm3, %v3949_v28 }
  0x47   : > { %3516 = vmatprep.subr.msk.bf16.mxu0 %vm4450_vm4, %v3949_v28 }
  0x48   : > { %3486 = vmatpush1.bf16.msk.msra.mxu1 %vm4457_vm10, %v3949_v28  ;;  %vm558_vm10 = vcmp.eq.s32.totalorder %v4478_v6, %v4098_v19 }
  0x49   : > { %3520 = vmatprep.subr.msk.bf16.mxu1 %vm3519_vm1, %v3949_v28  ;;  %vm554_vm1 = vcmp.eq.s32.totalorder %v4475_v5, %v4095_v18 }
  0x4a   : > { %3518 = vmatpush3.bf16.msk.msra.mxu0 %vm4450_vm4, %v3949_v28  ;;  %vm4490_vm4 = vmpackc.low %vm552_vm7, %vm549_vm2  ;;  %vm557_vm2 = vcmp.eq.s32.totalorder %v4475_v5, %v4098_v19  ;;  %vm555_vm7 = vcmp.eq.s32.totalorder %v4478_v6, %v4095_v18 }
  0x4b   : > { %3552 = vmatprep.subr.msk.bf16.mxu0 %vm4490_vm4, %v3949_v28  ;;  %vm4512_vm3 = vmpackc.low %vm557_vm2, %vm554_vm1  ;;  %vm561_vm1 = vcmp.eq.s32.totalorder %v4478_v6, %v4111_v22  ;;  %vm564_vm2 = vcmp.eq.s32.totalorder %v4478_v6, %v4114_v23 }
  0x4c   : > { %vm4520_vm0 = vmpackc.low %vm558_vm10, %vm555_vm7  ;;  %vm559_vm7 = vcmp.eq.s32.totalorder %v4498_v10, %v4111_v22 }
  0x4d   : > { %vm3525_vm10 = vmpackc.low %vm556_vm5, %vm553_vm8  ;;  %vm569_vm8 = vcmp.eq.s32.totalorder %v4475_v5, %v4162_v31 }
  0x4e   : > { %vm4551_vm5 = vmpackc.low %vm564_vm2, %vm561_vm1 }
 0x100   : > { %v3240_v13 = vpop.f32.mrb[0].mxu0 }
 0x101   : > { %v482_v14 = vpop.f32.mrb[1].mxu0 }
 0x102   : > { %1250 = vmatmul.mubr.f32.vlgmr.msra.gmra.mrb[0].mxu1 %v482_v14  ;;  %3279 = vmatprep.mubr.f32.mxu0 %v482_v14  ;;  %v873_v14 = vld [vmem:[%s4693_s24 + $0xc0] sm:$0xff] }
 0x103   : > { %3522 = vmatpush1.bf16.msk.msra.mxu1 %vm3521_vm13, %v3949_v28  ;;  %3280 = vmatmul.mubr.f32.vlgmr.msra.gmra.mrb[6].mxu0 %v3240_v13  ;;  %vm3527_vm13 = vmpackc.low %vm563_vm15, %vm560_vm12  ;;  %vm567_vm12 = vcmp.eq.s32.totalorder %v4478_v6, %v4159_v30  ;;  %vm570_vm15 = vcmp.eq.s32.totalorder %v4478_v6, %v4162_v31  ;;  %v3953_v31 = vmov 0  }
 0x104   : > { %3554 = vmatpush3.bf16.msk.msra.mxu0 %vm4490_vm4, %v3949_v28  ;;  %1255 = vmatprep.mubr.f32.mxu1 %v5367_v7  ;;  %v4537_v17 = vpop.f32.mrb[2].mxu0  ;;  %vm562_vm4 = vcmp.eq.s32.totalorder %v4498_v10, %v4114_v23  ;;  %vm4581_vm14 = vmpackc.low %vm570_vm15, %vm567_vm12  ;;  %vm571_vm12 = vcmp.eq.s32.totalorder %v4498_v10, %v4233_v37  ;;  %vm574_vm15 = vcmp.eq.s32.totalorder %v4498_v10, %v4236_v38 }
 0x105   : > { %3524 = vmatprep.subr.msk.bf16.mxu1 %vm4512_vm3, %v3949_v28  ;;  %3556 = vmatprep.subr.msk.bf16.mxu0 %vm4520_vm0, %v3949_v28  ;;  %v4549_v18 = vpop.f32.mrb[3].mxu0  ;;  %vm566_vm3 = vcmp.eq.s32.totalorder %v4475_v5, %v4159_v30  ;;  %vm3529_vm1 = vmpackc.low %vm562_vm4, %vm559_vm7  ;;  %vm573_vm7 = vcmp.eq.s32.totalorder %v4478_v6, %v4233_v37  ;;  %vm576_vm4 = vcmp.eq.s32.totalorder %v4478_v6, %v4236_v38 }
 0x106   : > { %1256 = vmatmul.mubr.f32.gmra.mrb[2].mxu1 %v3240_v13  ;;  %3314 = vmatprep.mubr.f32.mxu0 %v4549_v18  ;;  %vm3531_vm2 = vmpackc.low %vm569_vm8, %vm566_vm3  ;;  %v855_v13 = vld [vmem:[%s4693_s24 + $0x30] sm:$0xff] }
 0x107   : > { %3526 = vmatpush1.bf16.msk.msra.mxu1 %vm3525_vm10, %v3949_v28  ;;  %1401 = vmatprep.mubr.f32.mxu1 %v5367_v7  ;;  %vm565_vm10 = vcmp.eq.s32.totalorder %v4498_v10, %v4159_v30  ;;  %v866_v30 = vld [vmem:[%s4693_s24 + $0x88] sm:$0xff] }
 0x108   : > { %3558 = vmatpush3.bf16.msk.msra.mxu0 %vm4520_vm0, %v3949_v28  ;;  %3528 = vmatprep.subr.msk.bf16.mxu1 %vm3527_vm13, %v3949_v28  ;;  %v4570_v20 = vpop.f32.mrb[4].mxu0  ;;  %vm572_vm0 = vcmp.eq.s32.totalorder %v4475_v5, %v4233_v37  ;;  %vm575_vm13 = vcmp.eq.s32.totalorder %v4475_v5, %v4236_v38  ;;  %vm3533_vm3 = vmpackc.low %vm568_vm11, %vm565_vm10  ;;  %vm581_vm11 = vcmp.eq.s32.totalorder %v4475_v5, %v4291_v45  ;;  %v850_v37 = vld [vmem:[%s4693_s24 + $0x8] sm:$0xff]  ;;  %v865_v38 = vld [vmem:[%s4693_s24 + $0x80] sm:$0xff] }
 0x109   : > { %3560 = vmatprep.subr.msk.bf16.mxu0 %vm4551_vm5, %v3949_v28  ;;  %v4579_v21 = vpop.f32.mrb[5].mxu0  ;;  %vm3535_vm8 = vmpackc.low %vm575_vm13, %vm572_vm0  ;;  %vm582_vm10 = vcmp.eq.s32.totalorder %v4478_v6, %v4291_v45  ;;  %3834 = vset.pattern.permute.xlu1 %v3953_v31 }
 0x10a   : > { %vm3537_vm0 = vmpackc.low %vm574_vm15, %vm571_vm12  ;;  %vm585_vm12 = vcmp.eq.s32.totalorder %v4478_v6, %v4332_v49  ;;  %vm588_vm15 = vcmp.eq.s32.totalorder %v4478_v6, %v4335_v50  ;;  %3833 = vset.pattern.permute.xlu0 %v3953_v31  ;;  %949 = vperm.xlu1 %3834, %v866_v30   ;;  %v859_v30 = vld [vmem:[%s4693_s24 + $0x50] sm:$0xff]  ;;  %v877_v31 = vld [vmem:[%s4693_s24 + $0xe0] sm:$0xff] }
 0x10b   : > { %3530 = vmatpush1.bf16.msk.msra.mxu1 %vm3529_vm1, %v3949_v28  ;;  %vm4605_vm1 = vmpackc.low %vm576_vm4, %vm573_vm7  ;;  %vm577_vm7 = vcmp.eq.s32.totalorder %v4498_v10, %v4288_v44  ;;  %vm580_vm4 = vcmp.eq.s32.totalorder %v4498_v10, %v4291_v45  ;;  %946 = vperm.xlu0 %3833, %v865_v38   ;;  %v868_v45 = vld [vmem:[%s4693_s24 + $0x98] sm:$0xff]  ;;  %v879_v38 = vld [vmem:[%s4693_s24 + $0xf0] sm:$0xff] }
 0x10c   : > { %3562 = vmatpush3.bf16.msk.msra.mxu0 %vm4551_vm5, %v3949_v28  ;;  %3532 = vmatprep.subr.msk.bf16.mxu1 %vm3531_vm2, %v3949_v28  ;;  %vm578_vm5 = vcmp.eq.s32.totalorder %v4475_v5, %v4288_v44  ;;  %vm579_vm2 = vcmp.eq.s32.totalorder %v4478_v6, %v4288_v44  ;;  %v854_v44 = vld [vmem:[%s4693_s24 + $0x28] sm:$0xff] }
 0x10d   : > { %3564 = vmatprep.subr.msk.bf16.mxu0 %vm4581_vm14, %v3949_v28  ;;  %vm3539_vm13 = vmpackc.low %vm581_vm11, %vm578_vm5 }
 0x10e   : > { %vm3541_vm5 = vmpackc.low %vm580_vm4, %vm577_vm7  ;;  %vm594_vm7 = vcmp.eq.s32.totalorder %v4478_v6, %v4377_v55  ;;  %898 = vperm.xlu1 %3834, %v849_v34   ;;  %v891_v34 = vld [vmem:[%s4693_s24 + $0x150] sm:$0xff] }
 0x10f   : > { %3534 = vmatpush1.bf16.msk.msra.mxu1 %vm3533_vm3, %v3949_v28  ;;  %vm4629_vm3 = vmpackc.low %vm582_vm10, %vm579_vm2  ;;  %vm583_vm2 = vcmp.eq.s32.totalorder %v4498_v10, %v4332_v49  ;;  %vm586_vm10 = vcmp.eq.s32.totalorder %v4498_v10, %v4335_v50  ;;  %1003 = vperm.xlu0 %3833, %v884_v41   ;;  %v893_v41 = vld [vmem:[%s4693_s24 + $0x160] sm:$0xff] }
 0x110   : > { %3566 = vmatpush3.bf16.msk.msra.mxu0 %vm4581_vm14, %v3949_v28  ;;  %3536 = vmatprep.subr.msk.bf16.mxu1 %vm3535_vm8, %v3949_v28  ;;  %vm584_vm14 = vcmp.eq.s32.totalorder %v4475_v5, %v4332_v49  ;;  %vm587_vm8 = vcmp.eq.s32.totalorder %v4475_v5, %v4335_v50  ;;  %vm3545_vm4 = vmpackc.low %vm586_vm10, %vm583_vm2  ;;  %v872_v49 = vld [vmem:[%s4693_s24 + $0xb8] sm:$0xff]  ;;  %v881_v50 = vld [vmem:[%s4693_s24 + $0x100] sm:$0xff] }
 0x111   : > { %3568 = vmatprep.subr.msk.bf16.mxu0 %vm4605_vm1, %v3949_v28  ;;  %vm3543_vm11 = vmpackc.low %vm587_vm8, %vm584_vm14  ;;  %vm589_vm8 = vcmp.eq.s32.totalorder %v4498_v10, %v4374_v54 }
 0x112   : > { %901 = vperm.xlu1 %3834, %v850_v37   ;;  %v861_v37 = vld [vmem:[%s4693_s24 + $0x60] sm:$0xff] }
 0x113   : > { %3538 = vmatpush1.bf16.msk.msra.mxu1 %vm3537_vm0, %v3949_v28  ;;  %vm3575_vm0 = vmpackc.low %vm588_vm15, %vm585_vm12  ;;  %vm592_vm12 = vcmp.eq.s32.totalorder %v4498_v10, %v4377_v55  ;;  %913 = vperm.xlu0 %3833, %v854_v44   ;;  %v885_v10 = vld [vmem:[%s4693_s24 + $0x120] sm:$0xff] }
 0x114   : > { %3570 = vmatpush3.bf16.msk.msra.mxu0 %vm4605_vm1, %v3949_v28  ;;  %3540 = vmatprep.subr.msk.bf16.mxu1 %vm3539_vm13, %v3949_v28  ;;  %vm593_vm1 = vcmp.eq.s32.totalorder %v4475_v5, %v4377_v55  ;;  %vm591_vm13 = vcmp.eq.s32.totalorder %v4478_v6, %v4374_v54  ;;  %v882_v54 = vld [vmem:[%s4693_s24 + $0x108] sm:$0xff]  ;;  %v851_v55 = vld [vmem:[%s4693_s24 + $0x10] sm:$0xff]  ;;  %v853_v6 = vld [vmem:[%s4693_s24 + $0x20] sm:$0xff] }
 0x115   : > { %3572 = vmatprep.subr.msk.bf16.mxu0 %vm4629_vm3, %v3949_v28  ;;  %vm3547_vm14 = vmpackc.low %vm593_vm1, %vm590_vm6  ;;  %vm5371_vm6 = vmmov 0   ;;  %v883_v5 = vld [vmem:[%s4693_s24 + $0x110] sm:$0xff] }
 0x116   : > { %vm3579_vm15 = vmpackc.low %vm594_vm7, %vm591_vm13  ;;  %952 = vperm.xlu1 %3834, %v867_v43   ;;  %v863_v43 = vld [vmem:[%s4693_s24 + $0x70] sm:$0xff] }
 0x117   : > { %3542 = vmatpush1.bf16.msk.msra.mxu1 %vm3541_vm5, %v3949_v28  ;;  %967 = vperm.xlu0 %3833, %v872_v49   ;;  %vm5369_vm5 = vcmask 130048  }
 0x118   : > { %3574 = vmatpush3.bf16.msk.msra.mxu0 %vm4629_vm3, %v3949_v28  ;;  %3544 = vmatprep.subr.msk.bf16.mxu1 %vm3543_vm11, %v3949_v28  ;;  %vm3549_vm3 = vmpackc.low %vm592_vm12, %vm589_vm8 }
 0x119   : > { %3576 = vmatprep.subr.msk.bf16.mxu0 %vm3575_vm0, %v3949_v28 }
 0x11a   : > { %955 = vperm.xlu1 %3834, %v868_v45  }
 0x11b   : > { %3546 = vmatpush1.bf16.msk.msra.mxu1 %vm3545_vm4, %v3949_v28 }
 0x11c   : > { %3578 = vmatpush3.bf16.msk.msra.mxu0 %vm3575_vm0, %v3949_v28  ;;  %3548 = vmatprep.subr.msk.bf16.mxu1 %vm3547_vm14, %v3949_v28 }
 0x11d   : > { %3580 = vmatprep.subr.msk.bf16.mxu0 %vm3579_vm15, %v3949_v28 }
 0x11e   : > { %994 = vperm.xlu1 %3834, %v881_v50  }
 0x11f   : > { %3550 = vmatpush1.bf16.msk.msra.mxu1 %vm3549_vm3, %v3949_v28 }
 0x120   : > { %3582 = vmatpush3.bf16.msk.msra.mxu0 %vm3579_vm15, %v3949_v28 }
 0x121   : > { %3622 = vmatprep.subr.bf16.mxu0 %v5382_v27 }
 0x122   : > { %1402 = vmatmul.mubr.f32.vlgmr.msra.gmra.mrb[4].mxu1 %v4549_v18  ;;  %997 = vperm.xlu1 %3834, %v882_v54   ;;  %v895_v54 = vld [vmem:[%s4693_s24 + $0x170] sm:$0xff] }
 0x123   : > { %3315 = vmatmul.mubr.f32.vlgmr.msra.gmra.mrb[8].mxu0 %v4537_v17  ;;  %1407 = vmatprep.mubr.f32.mxu1 %v5367_v7 }
 0x124   : > { %3317 = vmatprep.mubr.f32.mxu0 %v4579_v21 }
 0x126   : > { %1408 = vmatmul.mubr.f32.gmra.mrb[6].mxu1 %v4537_v17  ;;  %904 = vperm.xlu1 %3834, %v851_v55   ;;  %v875_v17 = vld [vmem:[%s4693_s24 + $0xd0] sm:$0xff] }
 0x127   : > { %1413 = vmatprep.mubr.f32.mxu1 %v5367_v7  ;;  %3318 = vmatmul.mubr.f32.gmra.mrb[10].mxu0 %v4570_v20 }
 0x128   : > { %3359 = vmatprep.mubr.msk.f32.mxu0 %vm5371_vm6, %v5367_v7 }
 0x12a   : > { %1414 = vmatmul.mubr.f32.gmra.mrb[8].mxu1 %v4579_v21  ;;  %907 = vperm.xlu1 %3834, %v852_v0   ;;  %v889_v21 = vld [vmem:[%s4693_s24 + $0x140] sm:$0xff] }
 0x12b   : > { %1419 = vmatprep.mubr.f32.mxu1 %v5367_v7 }
 0x12e   : > { %1420 = vmatmul.mubr.f32.gmra.mrb[10].mxu1 %v4570_v20  ;;  %958 = vperm.xlu1 %3834, %v869_v3  }
 0x12f   : > { %1586 = vmatprep.mubr.f32.mxu1 %v5367_v7 }
 0x132   : > { %961 = vperm.xlu1 %3834, %v870_v4  }
 0x136   : > { %1000 = vperm.xlu1 %3834, %v883_v5  }
 0x13a   : > { %910 = vperm.xlu1 %3834, %v853_v6  }
 0x13e   : > { %964 = vperm.xlu1 %3834, %v871_v8  }
 0x142   : > { %1006 = vperm.xlu1 %3834, %v885_v10  }
 0x146   : > { %916 = vperm.xlu1 %3834, %v855_v13  }
 0x14a   : > { %970 = vperm.xlu1 %3834, %v873_v14   ;;  %v2345_v14 = vld [vmem:[%s5337_s3] sm:$0xff] }
 0x14e   : > { %1012 = vperm.xlu1 %3834, %v887_v16  }
 0x152   : > { %922 = vperm.xlu1 %3834, %v857_v15  }
 0x156   : > { %976 = vperm.xlu1 %3834, %v875_v17  }
 0x15a   : > { %1018 = vperm.xlu1 %3834, %v889_v21   ;;  %v2347_v21 = vld [vmem:[%s5337_s3 + $0x10] sm:$0xff] }
 0x15e   : > { %928 = vperm.xlu1 %3834, %v859_v30  }
 0x162   : > { %982 = vperm.xlu1 %3834, %v877_v31  }
 0x166   : > { %1024 = vperm.xlu1 %3834, %v891_v34   ;;  %v4757_v34 = vand.u32 127, %v518_v1 }
 0x16a   : > { %934 = vperm.xlu1 %3834, %v861_v37  }
 0x16e   : > { %988 = vperm.xlu1 %3834, %v879_v38  }
 0x172   : > { %1030 = vperm.xlu1 %3834, %v893_v41  }
 0x176   : > { %940 = vperm.xlu1 %3834, %v863_v43  }
 0x17a   : > { %1036 = vperm.xlu1 %3834, %v895_v54  }
 0x17e   : > { %2351 = vperm.xlu1 %3834, %v2345_v14  }
 0x182   : > { %2361 = vperm.xlu1 %3834, %v2347_v21  }
 0x189   : > { %v950_v30 = vpop.permute.xlu1 %949 }
 0x18a   : > { %vm1058_vm8 = vcmp.eq.s32.totalorder %v950_v30, %v4757_v34  ;;  %v5481_v30 = vmov 0 }
 0x18d   : > { %v899_v31 = vpop.permute.xlu1 %898 }
 0x18e   : > { %vm1041_vm11 = vcmp.eq.s32.totalorder %v899_v31, %v4757_v34 }
 0x191   : > { %v902_v37 = vpop.permute.xlu1 %901 }
 0x192   : > { %vm1042_vm2 = vcmp.eq.s32.totalorder %v902_v37, %v4757_v34 }
 0x193   : > { %vm4761_vm10 = vmpackc.low %vm1042_vm2, %vm1041_vm11 }
 0x195   : > { %v953_v38 = vpop.permute.xlu1 %952 }
 0x196   : > { %vm1059_vm0 = vcmp.eq.s32.totalorder %v953_v38, %v4757_v34 }
 0x199   : > { %v956_v43 = vpop.permute.xlu1 %955 }
 0x19a   : > { %vm1060_vm1 = vcmp.eq.s32.totalorder %v956_v43, %v4757_v34 }
 0x19b   : > { %vm4767_vm13 = vmpackc.low %vm1060_vm1, %vm1059_vm0 }
 0x19d   : > { %v995_v1 = vpop.permute.xlu1 %994 }
 0x19e   : > { %vm1073_vm7 = vcmp.eq.s32.totalorder %v995_v1, %v4757_v34 }
 0x1d5   : > { %v1251_v18 = vpop.f32.mrb[0].mxu1 }
 0x1d6   : > { %v1253_v19 = vpop.f32.mrb[1].mxu1  ;;  %v3281_v20 = vpop.f32.mrb[6].mxu0 }
 0x1d7   : > { %v1328_v22 = vpop.f32.mrb[7].mxu0 }
 0x1d9   : > { %v1257_v23 = vpop.f32.mrb[2].mxu1 }
 0x1da   : > { %v1259_v25 = vpop.f32.mrb[3].mxu1 }
 0x1f5   : > { %v1403_v44 = vpop.f32.mrb[4].mxu1 }
 0x1f6   : > { %v1512_v45 = vmul.f32 %v1403_v44, %v1251_v18  ;;  %v1405_v49 = vpop.f32.mrb[5].mxu1  ;;  %v3316_v50 = vpop.f32.mrb[8].mxu0 }
 0x1f7   : > { %v1513_v55 = vmul.f32 %v1405_v49, %v1253_v19  ;;  %v1517_v0 = vmul.f32 %v3316_v50, %v3281_v20  ;;  %v1492_v3 = vpop.f32.mrb[9].mxu0 }
 0x1f8   : > { %v1514_v4 = vmul.f32 %v1492_v3, %v1328_v22  ;;  %v1511_v22 = vld [vmem:[%s5338_s4] sm:$0x3] }
 0x1f9   : > { %v1409_v5 = vpop.f32.mrb[6].mxu1 }
 0x1fa   : > { %v3588_v6 = vpack.c.bf16 %v1517_v0, %v1514_v4  ;;  %v1515_v8 = vmul.f32 %v1409_v5, %v1257_v23  ;;  %v1411_v10 = vpop.f32.mrb[7].mxu1  ;;  %v4730_v13 = vpop.f32.mrb[10].mxu0 }
 0x1fb   : > { %5459 = vst [vmem:[#allocation8_spill] sm:$0xff] %v4730_v13  ;;  %v1516_v16 = vmul.f32 %v1411_v10, %v1259_v25  ;;  %v4735_v15 = vpop.f32.mrb[11].mxu0  ;;  %v947_v4 = vpop.permute.xlu0 %946 }
 0x1fc   : > { %5460 = vst [vmem:[#allocation9_spill] sm:$0xff] %v4735_v15  ;;  %v3585_v17 = vpack.c.bf16 %v1515_v8, %v1512_v45  ;;  %v998_v45 = vpop.permute.xlu1 %997  ;;  %vm1057_vm12 = vcmp.eq.s32.totalorder %v947_v4, %v4757_v34  ;;  %v874_v4 = vld [vmem:[%s4693_s24 + $0xc8] sm:$0xff] }
 0x1fd   : > { %v3583_v18 = vpack.c.bf16 %v1516_v16, %v1513_v55  ;;  %v4737_v19 = vpop.f32.mrb[8].mxu1  ;;  %vm1074_vm4 = vcmp.eq.s32.totalorder %v998_v45, %v4757_v34  ;;  %vm4785_vm11 = vmpackc.low %vm1058_vm8, %vm1057_vm12 }
 0x1fe   : > { %5461 = vst [vmem:[#allocation10_spill] sm:$0xff] %v4737_v19  ;;  %v4739_v20 = vpop.f32.mrb[9].mxu1  ;;  %vm4773_vm14 = vmpackc.low %vm1074_vm4, %vm1073_vm7 }
 0x1ff   : > { %5462 = vst [vmem:[#allocation11_spill] sm:$0xff] %v4739_v20  ;;  %3584 = vmatprep.subr.bf16.mxu1 %v3583_v18  ;;  %3624 = vmatpush3.bf16.msk.msra.mxu0 %vm4773_vm14, %v3949_v28  ;;  %v1004_v8 = vpop.permute.xlu0 %1003 }
 0x200   : > { %3586 = vmatpush1.bf16.msra.mxu1 %v3585_v17  ;;  %3625 = vmatprep.subr.bf16.mxu0 %v5382_v27  ;;  %v905_v50 = vpop.permute.xlu1 %904  ;;  %vm1076_vm12 = vcmp.eq.s32.totalorder %v1004_v8, %v4757_v34  ;;  %v858_v8 = vld [vmem:[%s4693_s24 + $0x48] sm:$0xff] }
 0x201   : > { %3587 = vmatprep.subr.bf16.mxu1 %v5382_v27  ;;  %v4748_v23 = vpop.f32.mrb[10].mxu1  ;;  %vm1043_vm15 = vcmp.eq.s32.totalorder %v905_v50, %v4757_v34 }
 0x202   : > { %5463 = vst [vmem:[#allocation12_spill] sm:$0xff] %v4748_v23  ;;  %v4750_v25 = vpop.f32.mrb[11].mxu1  ;;  %v5507_v23 = vmov 0  ;;  %v5562_v44 = vld [vmem:[#allocation8_spill] sm:$0xff] }
 0x203   : > { %5464 = vst [vmem:[#allocation13_spill] sm:$0xff] %v4750_v25  ;;  %2878 = vmatmul.mubr.msk.f32.vlgmr.msra.gmra.mrb[12].mxu1 %vm5369_vm5, %v1511_v22  ;;  %v914_v16 = vpop.permute.xlu0 %913 }
 0x204   : > { %3589 = vmatpush3.bf16.msra.mxu1 %v3588_v6  ;;  %3324 = vmatprep.mubr.msk.f32.mxu1 %vm5371_vm6, %v5367_v7  ;;  %v908_v54 = vpop.permute.xlu1 %907 }
 0x205   : > { %vm1044_vm3 = vcmp.eq.s32.totalorder %v908_v54, %v4757_v34  ;;  %3591 = vmatprep.subr.msk.bf16.mxu1 %vm4785_vm11, %v3949_v28  ;;  %v5563_v14 = vld [vmem:[#allocation10_spill] sm:$0xff] }
 0x206   : > { %vm4797_vm1 = vmpackc.low %vm1044_vm3, %vm1043_vm15 }
 0x207   : > { %3325 = vmatmul.mubr.msk.f32.vlgmr.msra.gmra.mrb[14].mxu1 %vm5369_vm5, %v1511_v22  ;;  %v968_v21 = vpop.permute.xlu0 %967  ;;  %v5564_v22 = vld [vmem:[#allocation9_spill] sm:$0xff] }
 0x208   : > { %v959_v55 = vpop.permute.xlu1 %958  ;;  %3593 = vmatpush3.bf16.msk.msra.mxu1 %vm4761_vm10, %v3949_v28 }
 0x209   : > { %vm1061_vm2 = vcmp.eq.s32.totalorder %v959_v55, %v4757_v34  ;;  %3595 = vmatprep.subr.msk.bf16.mxu1 %vm4767_vm13, %v3949_v28 }
 0x20c   : > { %v962_v0 = vpop.permute.xlu1 %961  ;;  %3597 = vmatpush3.bf16.msk.msra.mxu1 %vm4797_vm1, %v3949_v28 }
 0x20d   : > { %vm1062_vm0 = vcmp.eq.s32.totalorder %v962_v0, %v4757_v34  ;;  %v886_v0 = vld [vmem:[%s4693_s24 + $0x128] sm:$0xff] }
 0x20e   : > { %vm4804_vm7 = vmpackc.low %vm1062_vm0, %vm1061_vm2  ;;  %vm1046_vm2 = vcmp.eq.s32.totalorder %v914_v16, %v4757_v34  ;;  %v876_v16 = vld [vmem:[%s4693_s24 + $0xd8] sm:$0xff] }
 0x20f   : > { %3599 = vmatprep.subr.msk.bf16.mxu1 %vm4804_vm7, %v3949_v28 }
 0x210   : > { %v1001_v3 = vpop.permute.xlu1 %1000 }
 0x211   : > { %vm1075_vm4 = vcmp.eq.s32.totalorder %v1001_v3, %v4757_v34  ;;  %v856_v3 = vld [vmem:[%s4693_s24 + $0x38] sm:$0xff] }
 0x212   : > { %vm4815_vm3 = vmpackc.low %vm1076_vm12, %vm1075_vm4  ;;  %vm1064_vm4 = vcmp.eq.s32.totalorder %v968_v21, %v4757_v34  ;;  %v860_v21 = vld [vmem:[%s4693_s24 + $0x58] sm:$0xff] }
 0x213   : > { %3627 = vmatpush3.bf16.msk.msra.mxu0 %vm4815_vm3, %v3949_v28 }
 0x214   : > { %v911_v5 = vpop.permute.xlu1 %910  ;;  %3628 = vmatprep.subr.bf16.mxu0 %v5382_v27 }
 0x215   : > { %vm1045_vm8 = vcmp.eq.s32.totalorder %v911_v5, %v4757_v34  ;;  %v888_v5 = vld [vmem:[%s4693_s24 + $0x138] sm:$0xff] }
 0x216   : > { %vm4826_vm0 = vmpackc.low %vm1046_vm2, %vm1045_vm8  ;;  %vm5370_vm8 = vcmask 1041408  }
 0x217   : > { %3601 = vmatpush3.bf16.msk.msra.mxu1 %vm4826_vm0, %v3949_v28 }
 0x218   : > { %v965_v17 = vpop.permute.xlu1 %964 }
 0x219   : > { %vm1063_vm15 = vcmp.eq.s32.totalorder %v965_v17, %v4757_v34  ;;  %v890_v17 = vld [vmem:[%s4693_s24 + $0x148] sm:$0xff] }
 0x21a   : > { %vm4832_vm12 = vmpackc.low %vm1064_vm4, %vm1063_vm15 }
 0x21b   : > { %v5482_v30 = vsel %vm4832_vm12, 4294967295, %v5481_v30  ;;  %3603 = vmatprep.subr.msk.bf16.mxu1 %vm4832_vm12, %v3949_v28 }
 0x2d6   : > { %v4842_v31 = vpop.f32.mrb[12].mxu1 }
 0x2d7   : > { %v1664_v37 = vsel %vm5370_vm8, %v4842_v31, -inf  ;;  %v4846_v38 = vpop.f32.mrb[13].mxu1 }
 0x2d8   : > { %v1665_v43 = vsel %vm5370_vm8, %v4846_v38, -inf }
 0x2d9   : > { %v1667_v1 = vmax.f32 %v1664_v37, %v1665_v43  ;;  %v878_v37 = vld [vmem:[%s4693_s24 + $0xe8] sm:$0xff]  ;;  %v892_v43 = vld [vmem:[%s4693_s24 + $0x158] sm:$0xff] }
 0x2da   : > { %v4850_v45 = vpop.f32.mrb[14].mxu1 }
 0x2db   : > { %v1666_v50 = vsel %vm5370_vm8, %v4850_v45, -inf  ;;  %v3326_v54 = vpop.f32.mrb[15].mxu1 }
 0x2dc   : > { %v1668_v55 = vmax.f32 %v1667_v1, %v1666_v50  ;;  %v862_v1 = vld [vmem:[%s4693_s24 + $0x68] sm:$0xff]  ;;  %v880_v50 = vld [vmem:[%s4693_s24 + $0xf8] sm:$0xff] }
 0x2dd   : > { %v894_v54 = vld [vmem:[%s4693_s24 + $0x168] sm:$0xff] }
 0x2de   : > { %1669 = vmax.xlane.f32.xlu0 %v1668_v55  ;;  %v864_v55 = vld [vmem:[%s4693_s24 + $0x78] sm:$0xff] }
 0x2f4   : > { %1009 = vperm.xlu0 %3833, %v886_v0   ;;  %v896_v0 = vld [vmem:[%s4693_s24 + $0x178] sm:$0xff] }
 0x2f8   : > { %919 = vperm.xlu0 %3833, %v856_v3   ;;  %v2346_v3 = vld [vmem:[%s5337_s3 + $0x8] sm:$0xff] }
 0x2fc   : > { %973 = vperm.xlu0 %3833, %v874_v4   ;;  %v2348_v4 = vld [vmem:[%s5337_s3 + $0x18] sm:$0xff] }
 0x300   : > { %1015 = vperm.xlu0 %3833, %v888_v5   ;;  %v1007_v5 = vpop.permute.xlu1 %1006 }
 0x301   : > { %vm1077_vm15 = vcmp.eq.s32.totalorder %v1007_v5, %v4757_v34  ;;  %v5485_v5 = vmov 0 }
 0x304   : > { %925 = vperm.xlu0 %3833, %v858_v8   ;;  %v917_v8 = vpop.permute.xlu1 %916 }
 0x305   : > { %vm1047_vm5 = vcmp.eq.s32.totalorder %v917_v8, %v4757_v34 }
 0x308   : > { %979 = vperm.xlu0 %3833, %v876_v16   ;;  %v971_v16 = vpop.permute.xlu1 %970 }
 0x30c   : > { %1021 = vperm.xlu0 %3833, %v890_v17   ;;  %v1013_v17 = vpop.permute.xlu1 %1012 }
 0x310   : > { %931 = vperm.xlu0 %3833, %v860_v21  }
 0x314   : > { %985 = vperm.xlu0 %3833, %v878_v37  }
 0x318   : > { %1027 = vperm.xlu0 %3833, %v892_v43  }
 0x31c   : > { %937 = vperm.xlu0 %3833, %v862_v1   ;;  %v923_v1 = vpop.permute.xlu1 %922 }
 0x320   : > { %991 = vperm.xlu0 %3833, %v880_v50  }
 0x324   : > { %1033 = vperm.xlu0 %3833, %v894_v54  }
 0x328   : > { %943 = vperm.xlu0 %3833, %v864_v55  }
 0x32c   : > { %1039 = vperm.xlu0 %3833, %v896_v0  }
 0x330   : > { %2356 = vperm.xlu0 %3833, %v2346_v3   ;;  %v977_v3 = vpop.permute.xlu1 %976 }
 0x334   : > { %2366 = vperm.xlu0 %3833, %v2348_v4  }
 0x36b   : > { %v1670_v21 = vpop.xlane.xlu0 %1669 }
 0x36c   : > { %v1671_v37 = vrot.slane %v1670_v21, 4 }
 0x36e   : > { %v1672_v43 = vmax.f32 %v1670_v21, %v1671_v37  ;;  %v1019_v37 = vpop.permute.xlu1 %1018 }
 0x370   : > { %v1673_v50 = vrot.slane %v1672_v43, 2 }
 0x372   : > { %v1674_v54 = vmax.f32 %v1672_v43, %v1673_v50  ;;  %v5487_v50 = vmov 0 }
 0x373   : > { %v1010_v55 = vpop.permute.xlu0 %1009 }
 0x374   : > { %vm1078_vm2 = vcmp.eq.s32.totalorder %v1010_v55, %v4757_v34  ;;  %v1675_v0 = vrot.slane %v1674_v54, 1  ;;  %v5489_v55 = vmov 0 }
 0x375   : > { %vm4877_vm4 = vmpackc.low %vm1078_vm2, %vm1077_vm15  ;;  %vm1065_vm15 = vcmp.eq.s32.totalorder %v971_v16, %v4757_v34 }
 0x376   : > { %3630 = vmatpush3.bf16.msk.msra.mxu0 %vm4877_vm4, %v3949_v28  ;;  %v1676_v4 = vmax.f32 %v1674_v54, %v1675_v0  ;;  %v929_v54 = vpop.permute.xlu1 %928 }
 0x377   : > { %v920_v21 = vpop.permute.xlu0 %919  ;;  %3631 = vmatprep.subr.bf16.mxu0 %v5382_v27 }
 0x378   : > { %vm1048_vm8 = vcmp.eq.s32.totalorder %v920_v21, %v4757_v34  ;;  %3778 = vpush %v1676_v4  ;;  %v5493_v21 = vmov 0 }
 0x379   : > { %vm4887_vm6 = vmpackc.low %vm1048_vm8, %vm1047_vm5  ;;  %vm1079_vm5 = vcmp.eq.s32.totalorder %v1013_v17, %v4757_v34  ;;  %v5491_v17 = vmov 0 }
 0x37a   : > { %v5486_v5 = vsel %vm4887_vm6, 4294967295, %v5485_v5  ;;  %3605 = vmatpush3.bf16.msk.msra.mxu1 %vm4887_vm6, %v3949_v28  ;;  %v983_v0 = vpop.permute.xlu1 %982 }
 0x37b   : > { %v974_v43 = vpop.permute.xlu0 %973 }
 0x37c   : > { %vm1066_vm2 = vcmp.eq.s32.totalorder %v974_v43, %v4757_v34 }
 0x37d   : > { %vm4896_vm12 = vmpackc.low %vm1066_vm2, %vm1065_vm15  ;;  %vm1049_vm15 = vcmp.eq.s32.totalorder %v923_v1, %v4757_v34 }
 0x37e   : > { %v5488_v50 = vsel %vm4896_vm12, 4294967295, %v5487_v50  ;;  %3607 = vmatprep.subr.msk.bf16.mxu1 %vm4896_vm12, %v3949_v28  ;;  %v1025_v43 = vpop.permute.xlu1 %1024 }
 0x37f   : > { %v1016_v8 = vpop.permute.xlu0 %1015 }
 0x380   : > { %vm1080_vm8 = vcmp.eq.s32.totalorder %v1016_v8, %v4757_v34  ;;  %v5495_v8 = vmov 0 }
 0x381   : > { %vm4905_vm6 = vmpackc.low %vm1080_vm8, %vm1079_vm5  ;;  %vm1067_vm5 = vcmp.eq.s32.totalorder %v977_v3, %v4757_v34 }
 0x382   : > { %v5490_v55 = vsel %vm4905_vm6, 4294967295, %v5489_v55  ;;  %3633 = vmatpush3.bf16.msk.msra.mxu0 %vm4905_vm6, %v3949_v28 }
 0x383   : > { %v926_v16 = vpop.permute.xlu0 %925  ;;  %3634 = vmatprep.subr.bf16.mxu0 %v5382_v27 }
 0x384   : > { %vm1050_vm2 = vcmp.eq.s32.totalorder %v926_v16, %v4757_v34  ;;  %v935_v16 = vpop.permute.xlu1 %934 }
 0x385   : > { %vm4915_vm12 = vmpackc.low %vm1050_vm2, %vm1049_vm15  ;;  %vm1081_vm15 = vcmp.eq.s32.totalorder %v1019_v37, %v4757_v34  ;;  %v5497_v37 = vmov 0 }
 0x386   : > { %v5492_v17 = vsel %vm4915_vm12, 4294967295, %v5491_v17  ;;  %3609 = vmatpush3.bf16.msk.msra.mxu1 %vm4915_vm12, %v3949_v28 }
 0x387   : > { %v980_v4 = vpop.permute.xlu0 %979 }
 0x388   : > { %vm1068_vm8 = vcmp.eq.s32.totalorder %v980_v4, %v4757_v34 }
 0x389   : > { %vm4924_vm6 = vmpackc.low %vm1068_vm8, %vm1067_vm5  ;;  %vm1051_vm5 = vcmp.eq.s32.totalorder %v929_v54, %v4757_v34 }
 0x38a   : > { %v5494_v21 = vsel %vm4924_vm6, 4294967295, %v5493_v21  ;;  %3611 = vmatprep.subr.msk.bf16.mxu1 %vm4924_vm6, %v3949_v28 }
 0x38b   : > { %v1022_v1 = vpop.permute.xlu0 %1021 }
 0x38c   : > { %vm1082_vm2 = vcmp.eq.s32.totalorder %v1022_v1, %v4757_v34  ;;  %v5499_v1 = vmov 0 }
 0x38d   : > { %vm4933_vm12 = vmpackc.low %vm1082_vm2, %vm1081_vm15  ;;  %vm1069_vm15 = vcmp.eq.s32.totalorder %v983_v0, %v4757_v34 }
 0x38e   : > { %v5496_v8 = vsel %vm4933_vm12, 4294967295, %v5495_v8  ;;  %3636 = vmatpush3.bf16.msk.msra.mxu0 %vm4933_vm12, %v3949_v28 }
 0x38f   : > { %v932_v3 = vpop.permute.xlu0 %931  ;;  %3637 = vmatprep.subr.bf16.mxu0 %v5382_v27  ;;  %v5501_v27 = vmov 0 }
 0x390   : > { %vm1052_vm8 = vcmp.eq.s32.totalorder %v932_v3, %v4757_v34  ;;  %v989_v3 = vpop.permute.xlu1 %988 }
 0x391   : > { %vm4943_vm6 = vmpackc.low %vm1052_vm8, %vm1051_vm5  ;;  %vm1083_vm5 = vcmp.eq.s32.totalorder %v1025_v43, %v4757_v34  ;;  %v5504_v43 = vmov 0 }
 0x392   : > { %v5498_v37 = vsel %vm4943_vm6, 4294967295, %v5497_v37  ;;  %3613 = vmatpush3.bf16.msk.msra.mxu1 %vm4943_vm6, %v3949_v28 }
 0x393   : > { %v986_v4 = vpop.permute.xlu0 %985 }
 0x394   : > { %vm1070_vm2 = vcmp.eq.s32.totalorder %v986_v4, %v4757_v34  ;;  %v5503_v4 = vmov 0.0|0.0  }
 0x395   : > { %vm4952_vm12 = vmpackc.low %vm1070_vm2, %vm1069_vm15  ;;  %vm1053_vm15 = vcmp.eq.s32.totalorder %v935_v16, %v4757_v34 }
 0x396   : > { %v5500_v1 = vsel %vm4952_vm12, 4294967295, %v5499_v1  ;;  %3615 = vmatprep.subr.msk.bf16.mxu1 %vm4952_vm12, %v3949_v28 }
 0x397   : > { %v1028_v54 = vpop.permute.xlu0 %1027 }
 0x398   : > { %vm1084_vm8 = vcmp.eq.s32.totalorder %v1028_v54, %v4757_v34  ;;  %v1031_v54 = vpop.permute.xlu1 %1030 }
 0x399   : > { %vm4961_vm6 = vmpackc.low %vm1084_vm8, %vm1083_vm5  ;;  %vm1071_vm5 = vcmp.eq.s32.totalorder %v989_v3, %v4757_v34  ;;  %v2637_v3 = vld [vmem:[%s4076_s16 + $0x2] ss:$4 sm:$0x7]  ;;  %s3955_s16 = smov [#allocation4]  }
 0x39a   : > { %v5502_v27 = vsel %vm4961_vm6, 4294967295, %v5501_v27  ;;  %3639 = vmatpush3.bf16.msk.msra.mxu0 %vm4961_vm6, %v3949_v28  ;;  %v1692_v15 = vrot.slane %v2637_v3, %v4080_v9  ;;  %v1700_v13 = vrot.slane %v2637_v3, %v4086_v12  ;;  %s3857_s0 = sshll.u32 %s3955_s16, 4  ;;  %s3858_s0 = int_to_ptr.vmem [resolvable:$false] %s3857_s0 }
 0x39b   : > { %v938_v0 = vpop.permute.xlu0 %937  ;;  %3640 = vmatprep.subr.bf16.mxu0 %v5503_v4  ;;  %s3859_s23 = scalar_lea.vmem %s3858_s0, 192  ;;  %p3860_p0 = scmp.lt.s32.totalorder %s2507_s21, %s3858_s0 }
 0x39c   : > { %vm1054_vm2 = vcmp.eq.s32.totalorder %v938_v0, %v4757_v34  ;;  %v941_v0 = vpop.permute.xlu1 %940 }
 0x39d   : > { %vm4971_vm12 = vmpackc.low %vm1054_vm2, %vm1053_vm15  ;;  %vm1085_vm15 = vcmp.eq.s32.totalorder %v1031_v54, %v4757_v34  ;;  %v1696_v54 = vrot.slane %v2637_v3, %v4083_v11 }
 0x39e   : > { %v5505_v43 = vsel %vm4971_vm12, 4294967295, %v5504_v43  ;;  %3617 = vmatpush3.bf16.msk.msra.mxu1 %vm4971_vm12, %v3949_v28 }
 0x39f   : > { %5506 = vst [vmem:[#allocation14_spill] sm:$0xff] %v5505_v43  ;;  %v992_v25 = vpop.permute.xlu0 %991  ;;  %3835 = vrcp.f32 %v1696_v54 }
 0x3a0   : > { %vm1072_vm8 = vcmp.eq.s32.totalorder %v992_v25, %v4757_v34  ;;  %3837 = vrcp.f32 %v1692_v15 }
 0x3a1   : > { %vm4980_vm6 = vmpackc.low %vm1072_vm8, %vm1071_vm5  ;;  %vm1055_vm5 = vcmp.eq.s32.totalorder %v941_v0, %v4757_v34  ;;  %3839 = vrcp.f32 %v1700_v13  ;;  %v5520_v13 = vmov 0.0  }
 0x3a2   : > { %v5508_v23 = vsel %vm4980_vm6, 4294967295, %v5507_v23  ;;  %3619 = vmatprep.subr.msk.bf16.mxu1 %vm4980_vm6, %v3949_v28 }
 0x3a3   : > { %5509 = vst [vmem:[#allocation15_spill] sm:$0xff] %v5508_v23  ;;  %v1034_v16 = vpop.permute.xlu0 %1033  ;;  %v1037_v23 = vpop.permute.xlu1 %1036 }
 0x3a4   : > { %vm1086_vm2 = vcmp.eq.s32.totalorder %v1034_v16, %v4757_v34  ;;  %v5512_v16 = vmov 0 }
 0x3a5   : > { %vm4989_vm12 = vmpackc.low %vm1086_vm2, %vm1085_vm15  ;;  %vm1087_vm15 = vcmp.eq.s32.totalorder %v1037_v23, %v4757_v34 }
 0x3a6   : > { %3642 = vmatpush3.bf16.msk.msra.mxu0 %vm4989_vm12, %v3949_v28  ;;  %v5556_v7 = vld [vmem:[#allocation14_spill] sm:$0xff] }
 0x3a7   : > { %v944_v25 = vpop.permute.xlu0 %943  ;;  %3643 = vmatprep.subr.bf16.mxu0 %v5503_v4 }
 0x3a8   : > { %vm1056_vm8 = vcmp.eq.s32.totalorder %v944_v25, %v4757_v34 }
 0x3a9   : > { %vm5001_vm6 = vmpackc.low %vm1056_vm8, %vm1055_vm5  ;;  %s3779_s24 = spop %3778  ;;  %v3836_v26 = vpop.eup %3835  ;;  %vm5518_vm8 = vnez %v5402_v29 }
 0x3aa   : > { %v5513_v16 = vsel %vm5001_vm6, 4294967295, %v5512_v16  ;;  %v1678_v19 = vstv %s3779_s24  ;;  %3621 = vmatpush3.bf16.msk.msra.mxu1 %vm5001_vm6, %v3949_v28  ;;  %vm5522_vm6 = vnez %v5406_v33  ;;  %s3853_s24 = scalar_lea.vmem %s2507_s21, 96 }
 0x3ab   : > { %5514 = vst [vmem:[#allocation16_spill] sm:$0xff] %v5513_v16  ;;  %v1679_v0 = vsub.f32 %v4842_v31, %v1678_v19  ;;  %v1680_v25 = vsub.f32 %v4846_v38, %v1678_v19  ;;  %v1681_v11 = vsub.f32 %v4850_v45, %v1678_v19  ;;  %v1040_v43 = vpop.permute.xlu0 %1039  ;;  %3647 = vmatprep.subr.msk.bf16.mxu1 %vm4132_vm9, %v3949_v28  ;;  %v3838_v19 = vpop.eup %3837  ;;  %p3854_p11 = scmp.ne.s32.totalorder %s2507_s21, %s3853_s24  ;;  %p3861_p1 = scmp.lt.s32.totalorder %s3859_s23, %s3853_s24 }
 0x3ac   : > { %vm1088_vm2 = vcmp.eq.s32.totalorder %v1040_v43, %v4757_v34  ;;  %v3840_v23 = vpop.eup %3839  ;;  %vm5517_vm9 = vnez %v5398_v24 }
 0x3ad   : > { %v1682_v9 = vmul.f32 1.442695, %v1679_v0  ;;  %v1684_v16 = vmul.f32 1.442695, %v1680_v25  ;;  %v1686_v12 = vmul.f32 1.442695, %v1681_v11  ;;  %vm5018_vm5 = vmpackc.low %vm1088_vm2, %vm1087_vm15  ;;  %vm5519_vm15 = vnez %v5404_v32  ;;  %p3855_p12 = pnand %p3854_p11, %p4047_p5  ;;  %p3862_p2 = por %p3861_p1, %p3860_p0 }
 0x3ae   : > { %3645 = vmatpush3.bf16.msk.msra.mxu0 %vm5018_vm5, %v3949_v28  ;;  %vm5521_vm2 = vmmov 0  }
 0x3af   : > { %3841 = vpow2.f32 %v1682_v9  ;;  %3678 = vmatprep.subr.bf16.mxu0 %v5503_v4  ;;  %p3856_p13 = pneg %p3855_p12 }
 0x3b0   : > { %3843 = vpow2.f32 %v1684_v16  ;;  %v2341_v16 = vld [vmem:[%s5336_s2] sm:$0xff] }
 0x3b1   : > { %3845 = vpow2.f32 %v1686_v12  ;;  %p3863_p3 = pnand %p3862_p2, %p3856_p13 }
 0x3b2   : > { %v5560_v41 = vld [vmem:[#allocation16_spill] sm:$0xff] }
 0x3b9   : > { %v3842_v34 = vpop.eup %3841 }
 0x3ba   : > { %v3844_v31 = vpop.eup %3843  ;;  %v5026_v38 = vmul.f32 %v3842_v34, %v3838_v19 }
 0x3bb   : > { %v3846_v45 = vpop.eup %3845  ;;  %v5028_v43 = vmul.f32 %v3844_v31, %v3836_v26 }
 0x3bc   : > { %v5030_v15 = vmul.f32 %v3846_v45, %v3840_v23  ;;  %v2343_v45 = vld [vmem:[%s5336_s2 + $0x10] sm:$0xff] }
 0x3bd   : > { %1774 = vmatprep.mubr.f32.mxu1 %v5028_v43 }
 0x3be   : > { %3360 = vmatmul.mubr.f32.vlgmr.msra.gmra.mrb[12].mxu0 %v5030_v15  ;;  %1775 = vmatmul.mubr.f32.vlgmr.msra.gmra.mrb[16].mxu1 %v5026_v38 }
 0x3bf   : > { %3649 = vmatpush1.bf16.msk.msra.mxu1 %vm5517_vm9, %v3949_v28  ;;  %3680 = vmatpush3.bf16.msk.msra.mxu0 %vm5518_vm8, %v3949_v28  ;;  %vm5523_vm9 = vnez %v5408_v35  ;;  %vm5524_vm8 = vnez %v5410_v36 }
 0x3c0   : > { %3651 = vmatprep.subr.msk.bf16.mxu1 %vm5519_vm15, %v3949_v28  ;;  %3681 = vmatprep.subr.bf16.mxu0 %v5503_v4  ;;  %vm5525_vm15 = vnez %v5412_v39  ;;  %v2018_v39 = vld [vmem:[%s5339_s5] sm:$0xff] }
 0x3c1   : > { %1914 = vmatprep.mubr.f32.mxu1 %v5520_v13  ;;  %3394 = vmatprep.mubr.msk.f32.mxu0 %vm5521_vm2, %v5520_v13  ;;  %vm5526_vm2 = vnez %v5414_v40 }
 0x3c3   : > { %3653 = vmatpush1.bf16.msk.msra.mxu1 %vm5522_vm6, %v3949_v28  ;;  %3683 = vmatpush3.bf16.msk.msra.mxu0 %vm5523_vm9, %v3949_v28  ;;  %vm5527_vm6 = vnez %v5416_v42  ;;  %vm5528_vm9 = vnez %v5420_v47 }
 0x3c4   : > { %3655 = vmatprep.subr.msk.bf16.mxu1 %vm5524_vm8, %v3949_v28  ;;  %3684 = vmatprep.subr.bf16.mxu0 %v5503_v4  ;;  %vm5529_vm8 = vnez %v5418_v46 }
 0x3c7   : > { %3657 = vmatpush1.bf16.msk.msra.mxu1 %vm5525_vm15, %v3949_v28  ;;  %3686 = vmatpush3.bf16.msk.msra.mxu0 %vm5526_vm2, %v3949_v28  ;;  %vm5530_vm15 = vnez %v5422_v48  ;;  %vm5531_vm2 = vnez %v5426_v52  ;;  %v3954_v48 = vmov 1983009808  }
 0x3c8   : > { %3659 = vmatprep.subr.msk.bf16.mxu1 %vm5527_vm6, %v3949_v28  ;;  %3687 = vmatprep.subr.bf16.mxu0 %v5503_v4  ;;  %vm5532_vm6 = vnez %v5424_v51  ;;  %v2002_v51 = vunpack.c.l.s4 %v3954_v48 }
 0x3ca   : > { %v2003_v52 = vunpack.c.0.s8 %v2002_v51 }
 0x3cb   : > { %3661 = vmatpush1.bf16.msk.msra.mxu1 %vm5528_vm9, %v3949_v28  ;;  %3689 = vmatpush3.bf16.msk.msra.mxu0 %vm5529_vm8, %v3949_v28  ;;  %vm5533_vm9 = vnez %v5428_v53  ;;  %vm5534_vm8 = vnez %v5432_v57 }
 0x3cc   : > { %3663 = vmatprep.subr.msk.bf16.mxu1 %vm5530_vm15, %v3949_v28  ;;  %3690 = vmatprep.subr.bf16.mxu0 %v5503_v4  ;;  %vm5535_vm15 = vnez %v5430_v56 }
 0x3cf   : > { %3665 = vmatpush1.bf16.msk.msra.mxu1 %vm5531_vm2, %v3949_v28  ;;  %3692 = vmatpush3.bf16.msk.msra.mxu0 %vm5532_vm6, %v3949_v28  ;;  %vm5536_vm2 = vnez %v5434_v58  ;;  %vm5537_vm6 = vnez %v5438_v60 }
 0x3d0   : > { %3667 = vmatprep.subr.msk.bf16.mxu1 %vm5533_vm9, %v3949_v28  ;;  %3693 = vmatprep.subr.bf16.mxu0 %v5503_v4  ;;  %vm5538_vm9 = vnez %v5436_v59 }
 0x3d3   : > { %3669 = vmatpush1.bf16.msk.msra.mxu1 %vm5534_vm8, %v3949_v28  ;;  %3695 = vmatpush3.bf16.msk.msra.mxu0 %vm5535_vm15, %v3949_v28  ;;  %vm5539_vm8 = vnez %v5440_v61  ;;  %vm5540_vm15 = vnez %v5444_v63  ;;  %v2019_v61 = vld [vmem:[%s5339_s5 + $0x8] sm:$0xff] }
 0x3d4   : > { %3671 = vmatprep.subr.msk.bf16.mxu1 %vm5536_vm2, %v3949_v28  ;;  %3696 = vmatprep.subr.bf16.mxu0 %v5503_v4  ;;  %vm5541_vm2 = vnez %v5442_v62  ;;  %v2006_v62 = vsub.s32 %v2003_v52, %v4068_v2 }
 0x3d7   : > { %3673 = vmatpush1.bf16.msk.msra.mxu1 %vm5537_vm6, %v3949_v28  ;;  %3698 = vmatpush3.bf16.msk.msra.mxu0 %vm5538_vm9, %v3949_v28  ;;  %vm2020_vm6 = vcmask 15360   ;;  %vm5542_vm9 = vcmask 1041408  }
 0x3d8   : > { %3675 = vmatprep.subr.msk.bf16.mxu1 %vm5539_vm8, %v3949_v28  ;;  %3699 = vmatprep.subr.bf16.mxu0 %v5503_v4  ;;  %vm5543_vm8 = vmmov %vm5542_vm9 }
 0x3db   : > { %3677 = vmatpush1.bf16.msk.msra.mxu1 %vm5540_vm15, %v3949_v28  ;;  %3701 = vmatpush3.bf16.msk.msra.mxu0 %vm5541_vm2, %v3949_v28  ;;  %vm5544_vm15 = vmmov %vm5543_vm8 }
 0x3dc   : > { %vm5545_vm2 = vmmov %vm5543_vm8 }
 0x491   : > { %v1846_v24 = vpop.f32.mrb[12].mxu0  ;;  %v3126_v29 = vpop.f32.mrb[16].mxu1 }
 0x492   : > { %v3361_v32 = vpop.f32.mrb[13].mxu0  ;;  %v3127_v33 = vpop.f32.mrb[17].mxu1 }
 0x493   : > { %v3128_v35 = vadd.f32 %v3127_v33, %v3126_v29 }
 0x495   : > { %v1847_v36 = vadd.f32 %v3128_v35, %v1846_v24 }
 0x497   : > { %1915 = vmatmul.mubr.f32.vlgmr.msra.gmra.mrb[18].mxu1 %v1847_v36  ;;  %3395 = vmatmul.mubr.f32.vlgmr.msra.gmra.mrb[14].mxu0 %v1847_v36 }
 0x498   : > { %2097 = vmatprep.mubr.f32.mxu1 %v5520_v13  ;;  %3399 = vmatprep.mubr.msk.f32.mxu0 %vm2020_vm6, %v2018_v39 }
 0x56a   : > { %v1916_v40 = vpop.f32.mrb[18].mxu1  ;;  %v1987_v42 = vpop.f32.mrb[14].mxu0 }
 0x56b   : > { %3847 = vrcp.f32 %v1916_v40  ;;  %v1918_v46 = vpop.f32.mrb[19].mxu1  ;;  %v3396_v47 = vpop.f32.mrb[15].mxu0 }
 0x56c   : > { %3849 = vrcp.f32 %v1987_v42 }
 0x56d   : > { %3851 = vrcp.f32 %v1918_v46 }
 0x575   : > { %v3848_v53 = vpop.eup %3847 }
 0x576   : > { %v3850_v56 = vpop.eup %3849  ;;  %v1992_v57 = vmul.f32 %v3848_v53, %v5026_v38  ;;  %v2342_v38 = vld [vmem:[%s5336_s2 + $0x8] sm:$0xff] }
 0x577   : > { %v3852_v58 = vpop.eup %3851  ;;  %v1996_v59 = vmul.f32 %v3850_v56, %v5030_v15 }
 0x578   : > { %v1994_v60 = vmul.f32 %v3852_v58, %v5028_v43  ;;  %v2344_v43 = vld [vmem:[%s5336_s2 + $0x18] sm:$0xff] }
 0x579   : > { %3397 = vmatprep.subr.msk.mxu0 %vm5542_vm9, %v1996_v59  ;;  %v2014_v2 = vrot.slane %v1996_v59, %v2006_v62  ;;  %vm5557_vm9 = vnez %v5556_v7 }
 0x57a   : > { %2976 = vmatprep.subr.msk.mxu1 %vm5543_vm8, %v1994_v60  ;;  %3398 = vmatpush3.msk.msra.mxu0 %vm5544_vm15, %v1996_v59  ;;  %v2000_v63 = vcombine.low %v1992_v57, %v1994_v60  ;;  %vm5561_vm15 = vnez %v5560_v41 }
 0x57b   : > { %2977 = vmatpush1.msk.msra.mxu1 %vm5545_vm2, %v1992_v57  ;;  %3400 = vmatmul.mubr.msk.f32.vlgmr.msra.gmra.mrb[16].mxu0 %vm2020_vm6, %v2019_v61 }
 0x57c   : > { %3735 = vmatprep.subr.msk.bf16.mxu0 %vm4773_vm14, %v3949_v28  ;;  %2978 = vmatmul.mubr.msk.f32.vlgmr.msra.gmra.mrb[20].mxu1 %vm2020_vm6, %v2018_v39  ;;  %v2007_v4 = vrot.slane %v2000_v63, %v2006_v62 }
 0x57d   : > { %3703 = vmatprep.subr.msk.bf16.mxu1 %vm4785_vm11, %v3949_v28  ;;  %3737 = vmatpush3.bf16.msk.msra.mxu0 %vm4773_vm14, %v3949_v28  ;;  %vm5548_vm14 = vnez %v5486_v5  ;;  %vm5549_vm11 = vnez %v5496_v8 }
 0x57e   : > { %3705 = vmatpush3.bf16.msk.msra.mxu1 %vm4761_vm10, %v3949_v28  ;;  %3739 = vmatprep.subr.msk.bf16.mxu0 %vm4815_vm3, %v3949_v28  ;;  %v2015_v54 = vcombine.low %v2007_v4, %v2014_v2  ;;  %vm5546_vm10 = vnez %v5490_v55 }
 0x57f   : > { %3707 = vmatprep.subr.msk.bf16.mxu1 %vm4767_vm13, %v3949_v28  ;;  %2103 = vmatprep.mubr.f32.mxu1 %v5520_v13  ;;  %vm5547_vm13 = vnez %v5482_v30 }
 0x580   : > { %2979 = vmatmul.mubr.msk.f32.gmra.mrb[22].mxu1 %vm2020_vm6, %v2019_v61  ;;  %2017 = vst [vmem:[%s5156_s29] sm:$0x3f] %v2015_v54  ;;  %vm5555_vm6 = vnez %v5500_v1 }
 0x581   : > { %3741 = vmatpush3.bf16.msk.msra.mxu0 %vm4815_vm3, %v3949_v28  ;;  %vm5552_vm3 = vnez %v5502_v27  ;;  %v5558_v27 = vld [vmem:[#allocation15_spill] sm:$0xff] }
 0x582   : > { %3709 = vmatpush3.bf16.msk.msra.mxu1 %vm4797_vm1, %v3949_v28  ;;  %3743 = vmatprep.subr.msk.bf16.mxu0 %vm4877_vm4, %v3949_v28  ;;  %vm5550_vm1 = vnez %v5488_v50  ;;  %vm5559_vm8 = vnez %v5558_v27  ;;  %v5565_v50 = vld [vmem:[#allocation11_spill] sm:$0xff] }
 0x583   : > { %3711 = vmatprep.subr.msk.bf16.mxu1 %vm4804_vm7, %v3949_v28  ;;  %vm5551_vm7 = vnez %v5492_v17 }
 0x585   : > { %3745 = vmatpush3.bf16.msk.msra.mxu0 %vm4877_vm4, %v3949_v28  ;;  %vm5554_vm4 = vnez %v5498_v37 }
 0x586   : > { %3713 = vmatpush3.bf16.msk.msra.mxu1 %vm4826_vm0, %v3949_v28  ;;  %3747 = vmatprep.subr.msk.bf16.mxu0 %vm5546_vm10, %v3949_v28  ;;  %vm5553_vm0 = vnez %v5494_v21  ;;  %v5566_v21 = vld [vmem:[#allocation12_spill] sm:$0xff] }
 0x587   : > { %3715 = vmatprep.subr.msk.bf16.mxu1 %vm5547_vm13, %v3949_v28 }
 0x589   : > { %3749 = vmatpush3.bf16.msk.msra.mxu0 %vm5546_vm10, %v3949_v28 }
 0x58a   : > { %3717 = vmatpush3.bf16.msk.msra.mxu1 %vm5548_vm14, %v3949_v28  ;;  %3751 = vmatprep.subr.msk.bf16.mxu0 %vm5549_vm11, %v3949_v28 }
 0x58b   : > { %3719 = vmatprep.subr.msk.bf16.mxu1 %vm5550_vm1, %v3949_v28 }
 0x58d   : > { %3753 = vmatpush3.bf16.msk.msra.mxu0 %vm5549_vm11, %v3949_v28 }
 0x58e   : > { %3721 = vmatpush3.bf16.msk.msra.mxu1 %vm5551_vm7, %v3949_v28  ;;  %3755 = vmatprep.subr.msk.bf16.mxu0 %vm5552_vm3, %v3949_v28 }
 0x58f   : > { %3723 = vmatprep.subr.msk.bf16.mxu1 %vm5553_vm0, %v3949_v28 }
 0x591   : > { %3757 = vmatpush3.bf16.msk.msra.mxu0 %vm5552_vm3, %v3949_v28 }
 0x592   : > { %3725 = vmatpush3.bf16.msk.msra.mxu1 %vm5554_vm4, %v3949_v28  ;;  %3759 = vmatprep.subr.msk.bf16.mxu0 %vm4989_vm12, %v3949_v28 }
 0x593   : > { %3727 = vmatprep.subr.msk.bf16.mxu1 %vm5555_vm6, %v3949_v28 }
 0x595   : > { %3761 = vmatpush3.bf16.msk.msra.mxu0 %vm4989_vm12, %v3949_v28  ;;  %vm5568_vm12 = vcmask 130048  }
 0x596   : > { %3729 = vmatpush3.bf16.msk.msra.mxu1 %vm5557_vm9, %v3949_v28  ;;  %3763 = vmatprep.subr.msk.bf16.mxu0 %vm5018_vm5, %v3949_v28 }
 0x597   : > { %3731 = vmatprep.subr.msk.bf16.mxu1 %vm5559_vm8, %v3949_v28 }
 0x599   : > { %3765 = vmatpush3.bf16.msk.msra.mxu0 %vm5018_vm5, %v3949_v28  ;;  %vm5569_vm5 = vmmov %vm5568_vm12 }
 0x59a   : > { %3733 = vmatpush3.bf16.msk.msra.mxu1 %vm5561_vm15, %v3949_v28  ;;  %v5567_v28 = vld [vmem:[#allocation13_spill] sm:$0xff]  ;;  %vm5570_vm2 = vmmov %vm5569_vm5 }
 0x59b   : > { %vm5571_vm10 = vmmov %vm5570_vm2 }
 0x64e   : > { %v3401_v20 = vpop.f32.mrb[16].mxu0 }
 0x64f   : > { %v2190_v49 = vmul.f32 %v3401_v20, %v5562_v44  ;;  %v2099_v6 = vpop.f32.mrb[20].mxu1  ;;  %v2176_v10 = vpop.f32.mrb[17].mxu0 }
 0x650   : > { %v2185_v18 = vmul.f32 %v2099_v6, %v5563_v14  ;;  %v2187_v30 = vmul.f32 %v2176_v10, %v5564_v22  ;;  %v2101_v5 = vpop.f32.mrb[21].mxu1 }
 0x651   : > { %v2186_v55 = vmul.f32 %v2101_v5, %v5565_v50 }
 0x652   : > { %3434 = vmatprep.mubr.f32.mxu0 %v2187_v30 }
 0x653   : > { %v2105_v17 = vpop.f32.mrb[22].mxu1  ;;  %2255 = vmatprep.mubr.f32.mxu1 %v2186_v55  ;;  %3435 = vmatmul.mubr.f32.vlgmr.msra.gmra.mrb[18].mxu0 %v2190_v49 }
 0x654   : > { %v2188_v8 = vmul.f32 %v2105_v17, %v5566_v21  ;;  %v2107_v37 = vpop.f32.mrb[23].mxu1  ;;  %2256 = vmatmul.mubr.f32.vlgmr.msra.gmra.mrb[24].mxu1 %v2185_v18  ;;  %3441 = vmatprep.mubr.msk.f32.mxu0 %vm5568_vm12, %v2341_v16 }
 0x655   : > { %v2189_v1 = vmul.f32 %v2107_v37, %v5567_v28 }
 0x657   : > { %2260 = vmatprep.mubr.f32.mxu1 %v2189_v1 }
 0x658   : > { %2261 = vmatmul.mubr.f32.gmra.mrb[26].mxu1 %v2188_v8 }
 0x726   : > { %v3436_v0 = vpop.f32.mrb[18].mxu0 }
 0x727   : > { %v3198_v25 = vpop.f32.mrb[24].mxu1  ;;  %v2332_v11 = vpop.f32.mrb[19].mxu0 }
 0x728   : > { %v3199_v9 = vpop.f32.mrb[25].mxu1 }
 0x729   : > { %v3200_v12 = vadd.f32 %v3199_v9, %v3198_v25 }
 0x72b   : > { %v2333_v3 = vadd.f32 %v3200_v12, %v2332_v11  ;;  %v3201_v26 = vpop.f32.mrb[26].mxu1 }
 0x72c   : > { %v3202_v19 = vpop.f32.mrb[27].mxu1 }
 0x72d   : > { %v3203_v23 = vadd.f32 %v3202_v19, %v3201_v26 }
 0x72f   : > { %v2338_v34 = vadd.f32 %v3436_v0, %v3203_v23 }
 0x731   : > { %v3766_v31 = vpack.c.bf16 %v2338_v34, %v2333_v3 }
 0x733   : > { %3767 = vmatprep.subr.bf16.mxu0 %v3766_v31 }
 0x734   : > { %3769 = vmatpush3.bf16.msra.mxu0 %v3766_v31 }
 0x737   : > { %3442 = vmatmul.mubr.msk.f32.vlgmr.msra.gmra.mrb[20].mxu0 %vm5569_vm5, %v2342_v38 }
 0x738   : > { %3444 = vmatprep.mubr.msk.f32.mxu0 %vm5570_vm2, %v2343_v45 }
 0x73b   : > { %3445 = vmatmul.mubr.msk.f32.gmra.mrb[22].mxu0 %vm5571_vm10, %v2344_v43 }
 0x73c   : > { %3866 = shalt.err (!%p3863_p3)
}
 0x73d   : > { %s3867_s29 = scalar_lea.hbm %s5263_s17, 96  ;;  %s3871_s28 = scalar_lea.hbm %s5343_s9, 192 }
 0x73e   : > { %p3868_p4 = scmp.ne.s32.totalorder %s5263_s17, %s3867_s29  ;;  %p3872_p9 = scmp.lt.u32.totalorder %s5263_s17, %s5343_s9 }
 0x73f   : > { %p3873_p10 = scmp.lt.u32.totalorder %s3871_s28, %s3867_s29  ;;  %p3875_p12 = scmp.lt.u32.totalorder %s3867_s29, %s5263_s17 }
 0x740   : > { %p3869_p7 = pnand %p3868_p4, %p4047_p5 }
 0x741   : > { %p3874_p11 = por %p3873_p10, %p3872_p9 }
 0x742   : > { %p3870_p8 = pneg %p3869_p7 }
 0x743   : > { %p3876_p13 = por %p3875_p12, %p3874_p11 }
 0x745   : > { %p3877_p0 = pnand %p3876_p13, %p3870_p8 }
 0x747   : > { %3880 = shalt.err (!%p3877_p0)
}
 0x748   : > { %3782 = dma.vmem_to_hbm [thread:$0]  (%p4047_p5), %s2507_s21, 96, %s5263_s17, %s2476_s22   ;;  %v2357_v15 = vpop.permute.xlu0 %2356  ;;  %v2352_v13 = vpop.permute.xlu1 %2351 }
 0x749   : > { %s2625_s24 = sshll.u32 %s5121_s25, 5  ;;  %s3041_s29 = sshll.u32 %s4030_s13, 9 }
 0x74a   : > { %s359_s16 = scalar_lea.vmem [#allocation2], %s2625_s24  ;;  %s5291_s22 = scalar_lea.hbm %s5342_s8, %s3041_s29 }
 0x74b   : > { %s2489_s23 = sshll.u32 %s359_s16, 4  ;;  %s2471_s13 = scalar_lea.sflag [#allocation3], %s5121_s25  ;;  %s5286_s23 = int_to_ptr.vmem [resolvable:$true] %s2489_s23 }
 0x74c   : > { %v2367_v35 = vpop.permute.xlu0 %2366  ;;  %v2362_v39 = vpop.permute.xlu1 %2361  ;;  %s3881_s26 = scalar_lea.vmem %s5286_s23, 512  ;;  %s3956_s27 = smov [#allocation2]  }
 0x74d   : > { %p3882_p1 = scmp.ne.s32.totalorder %s5286_s23, %s3881_s26  ;;  %s3885_s28 = sshll.u32 %s3956_s27, 4  ;;  %s3886_s28 = int_to_ptr.vmem [resolvable:$false] %s3885_s28 }
 0x74e   : > { %s3887_s14 = scalar_lea.vmem %s3886_s28, 1024  ;;  %p3888_p4 = scmp.lt.s32.totalorder %s5286_s23, %s3886_s28 }
 0x74f   : > { %p3883_p2 = pnand %p3882_p1, %p4047_p5  ;;  %p3889_p7 = scmp.lt.s32.totalorder %s3887_s14, %s3881_s26 }
 0x751   : > { %p3884_p3 = pneg %p3883_p2  ;;  %p3890_p8 = por %p3889_p7, %p3888_p4 }
 0x753   : > { %p3891_p9 = pnand %p3890_p8, %p3884_p3 }
 0x80a   : > { %v3443_v24 = vpop.f32.mrb[20].mxu0 }
 0x80b   : > { %v2453_v29 = vadd.f32 %v3443_v24, %v2357_v15  ;;  %v2447_v32 = vpop.f32.mrb[21].mxu0 }
 0x80c   : > { %v2448_v33 = vadd.f32 %v2447_v32, %v2352_v13 }
 0x80d   : > { %2467 = vst [vmem:[%s359_s16 + $0x8] sm:$0xff] %v2453_v29 }
 0x80e   : > { %2466 = vst [vmem:[%s359_s16] sm:$0xff] %v2448_v33  ;;  %v3446_v36 = vpop.f32.mrb[22].mxu0 }
 0x80f   : > { %v2463_v40 = vadd.f32 %v3446_v36, %v2367_v35  ;;  %v2457_v42 = vpop.f32.mrb[23].mxu0 }
 0x810   : > { %v2458_v46 = vadd.f32 %v2457_v42, %v2362_v39 }
 0x811   : > { %2469 = vst [vmem:[%s359_s16 + $0x18] sm:$0xff] %v2463_v40 }
 0x812   : > { %2468 = vst [vmem:[%s359_s16 + $0x10] sm:$0xff] %v2458_v46 }
 0x813   : > { %3894 = shalt.err (!%p3891_p9)
}
 0x814   : > { %s3895_s0 = scalar_lea.hbm %s5291_s22, 512  ;;  %s3899_s29 = scalar_lea.hbm %s5342_s8, 1024 }
 0x815   : > { %p3896_p10 = scmp.ne.s32.totalorder %s5291_s22, %s3895_s0  ;;  %p3900_p13 = scmp.lt.u32.totalorder %s5291_s22, %s5342_s8 }
 0x816   : > { %p3901_p0 = scmp.lt.u32.totalorder %s3899_s29, %s3895_s0  ;;  %p3903_p2 = scmp.lt.u32.totalorder %s3895_s0, %s5291_s22 }
 0x817   : > { %p3897_p11 = pnand %p3896_p10, %p4047_p5 }
 0x818   : > { %p3902_p1 = por %p3901_p0, %p3900_p13 }
 0x819   : > { %p3898_p12 = pneg %p3897_p11 }
 0x81a   : > { %p3904_p3 = por %p3903_p2, %p3902_p1 }
 0x81c   : > { %p3905_p4 = pnand %p3904_p3, %p3898_p12 }
 0x81e   : > { %3908 = shalt.err (!%p3905_p4)
}
 0x81f   : > { %s3957_s26 = smov 128   ;;  %s3958_s27 = smov 8  }
 0x820   : > { %3781 = dma.vmem_to_hbm [thread:$0]  (%p4047_p5), %s5286_s23, 512, %s5291_s22, %s2471_s13, %s3957_s26, %s3957_s26, %s3958_s27  }
 0x821 PF: > { %p3792_p7 = scmp.ge.s32.totalorder %s3947_s12, 2  ;;  %s2518_s28 = sand.u32 1, %s3935_s30  }
 0x822   : > { %s2519_s14 = scalar_lea.sflag [#allocation3], %s2518_s28 }
 0x823   : > { %p3786_p8 = pnand %p3792_p7, %p4051_p6 }
 0x825   : > { %3926 = dma.done.wait (!%p3786_p8), %s2519_s14, 512  }
 0x826   : > { %3928 = vsyncadd (!%p3786_p8), %s2519_s14, 4294966784  ;;  %s2528_s0 = scalar_lea.sflag [#allocation5], %s2518_s28 }
 0x827   : > { %3930 = dma.done.wait (!%p3786_p8), %s2528_s0, 96  }
 0x828   : > { %3932 = vsyncadd (!%p3786_p8), %s2528_s0, 4294967200  ;;  %p23_p5 = scmp.ge.s32.totalorder %s4034_s15, 4   ;;  %s5572_s30 = smov %s3939_s10 }
 0x829   : > { %s5573_s10 = smov %s3943_s11  ;;  %s5574_s11 = smov %s4045_s18 }
 0x82a   : > { %s5575_s12 = smov %s4034_s15  ;;  %25 = sbr.rel (!%p23_p5) target bundleno = 7 (0x7), region = 112 }
 0x831   :  { %2533 = vsyncpa [#allocation3], 1 }
 0x832   :  { %2535 = vsyncpa [#allocation3 + $0x1], 1 }
 0x833   :  { %2536 = vsyncpa [#allocation5], 1 }
 0x834   :  { %2538 = vsyncpa [#allocation5 + $0x1], 1 }

</bundles_post_ra>
